<compile_context>
chip_gen: v5e
topology: v5e:2x2
jax: 0.10.0
libtpu: 0.0.40
codegen_flags: <defaults>
</compile_context>

<pallas_src>
import functools

import jax
import jax.numpy as jnp
from jax import lax
from jax.experimental import pallas as pl
from jax.experimental.pallas import tpu as pltpu


def _round_up(x: int, m: int) -> int:
    return (x + m - 1) // m * m


def cross_attention_kernel(
    xq_ref, xkv_ref,                                  # activations
    wq_ref, bq_ref, wk_ref, bk_ref,                   # Q / K params (pre-transposed)
    wv_ref, bv_ref, wo_ref, bo_ref,                   # V / O params (pre-transposed)
    o_ref,                                            # output tile
    k_vmem, v_vmem, ctx_vmem,                         # VMEM scratch
    *, n_heads: int, d_head: int, lkv_valid: int,
):
    qi = pl.program_id(1)

    # K/V projections once per batch element (first query tile); cache in VMEM.
    @pl.when(qi == 0)
    def _():
        xkv = xkv_ref[0].astype(jnp.bfloat16)                           # (Lkv_pad, d_cross)
        k = jnp.dot(xkv, wk_ref[...], preferred_element_type=jnp.float32) + bk_ref[...]
        v = jnp.dot(xkv, wv_ref[...], preferred_element_type=jnp.float32) + bv_ref[...]
        k_vmem[...] = k.astype(jnp.bfloat16)
        v_vmem[...] = v.astype(jnp.bfloat16)

    # Q projection (softmax scale already folded into wq/bq by the wrapper).
    xq = xq_ref[0].astype(jnp.bfloat16)                                 # (TQ, d_embed)
    q = jnp.dot(xq, wq_ref[...], preferred_element_type=jnp.float32) + bq_ref[...]
    q = q.astype(jnp.bfloat16)

    lkv_pad = k_vmem.shape[0]
    # Key-padding bias: 0 for real keys, -1e30 for padded columns.
    col = lax.broadcasted_iota(jnp.int32, (1, lkv_pad), 1)
    key_bias = jnp.where(col < lkv_valid, 0.0, -1e30).astype(jnp.float32)

    # Per-head attention via lane slicing (no head split/merge transposes).
    for h in range(n_heads):
        lo = h * d_head
        qh = q[:, lo:lo + d_head]                                       # (TQ, d_head) bf16
        kh = k_vmem[:, pl.ds(lo, d_head)]                               # (Lkv_pad, d_head) bf16
        vh = v_vmem[:, pl.ds(lo, d_head)]                               # (Lkv_pad, d_head) bf16

        # scores = qh @ kh^T  (contract the shared d_head axis; no explicit .T)
        s = lax.dot_general(qh, kh, (((1,), (1,)), ((), ())),
                            preferred_element_type=jnp.float32)         # (TQ, Lkv_pad) f32
        s = s + key_bias

        # Numerically stable softmax (stats in f32).
        m = jnp.max(s, axis=-1, keepdims=True)
        e = jnp.exp(s - m)
        denom = jnp.sum(e, axis=-1, keepdims=True)                      # (TQ, 1) f32

        ctx = jnp.dot(e.astype(jnp.bfloat16), vh,
                      preferred_element_type=jnp.float32)               # (TQ, d_head) f32
        # Normalize the small (TQ, d_head) context instead of the (TQ, Lkv) weights.
        ctx = ctx * pl.reciprocal(denom, approx=True)
        ctx_vmem[:, pl.ds(lo, d_head)] = ctx.astype(jnp.bfloat16)

    # Output projection.
    out = jnp.dot(ctx_vmem[...], wo_ref[...],
                  preferred_element_type=jnp.float32) + bo_ref[...]
    o_ref[0] = out.astype(o_ref.dtype)


def cross_attention(x_q, x_kv, params, n_heads: int, *, tq_max: int = 256):
    """x_q: (B, Lq, d_embed), x_kv: (B, Lkv, d_cross) -> (B, Lq, d_embed)."""
    B, Lq, d_embed = x_q.shape
    _, Lkv, d_cross = x_kv.shape
    assert d_embed % n_heads == 0
    d_head = d_embed // n_heads
    scale = float(d_head) ** -0.5

    # Wrapper-side weight prep: pre-transpose, fold softmax scale into Q, cast to bf16.
    wq_t = (params['wq'].T * scale).astype(jnp.bfloat16)   # (d_embed, d_embed)
    wk_t = params['wk'].T.astype(jnp.bfloat16)             # (d_cross, d_embed)
    wv_t = params['wv'].T.astype(jnp.bfloat16)             # (d_cross, d_embed)
    wo_t = params['wo'].T.astype(jnp.bfloat16)             # (d_embed, d_embed)
    bq = (params['bq'] * scale).reshape(1, d_embed).astype(jnp.float32)
    bk = params['bk'].reshape(1, d_embed).astype(jnp.float32)
    bv = params['bv'].reshape(1, d_embed).astype(jnp.float32)
    bo = params['bo'].reshape(1, d_embed).astype(jnp.float32)

    # Lane-dense key axis: pad Lkv to a multiple of 128 (masked inside the kernel).
    lkv_pad = _round_up(max(Lkv, 1), 128)
    if lkv_pad != Lkv:
        x_kv = jnp.pad(x_kv, ((0, 0), (0, lkv_pad - Lkv), (0, 0)))

    # Query tiling: TQ rows per grid step; pad Lq when it has to be tiled.
    if Lq <= tq_max:
        tq, lq_pad = Lq, Lq
    else:
        tq = tq_max
        lq_pad = _round_up(Lq, tq)
        if lq_pad != Lq:
            x_q = jnp.pad(x_q, ((0, 0), (0, lq_pad - Lq), (0, 0)))
    n_q_tiles = lq_pad // tq

    kernel = functools.partial(
        cross_attention_kernel,
        n_heads=n_heads, d_head=d_head, lkv_valid=Lkv)

    def full_spec(arr):
        nd = arr.ndim
        return pl.BlockSpec(arr.shape, lambda b, q, _nd=nd: (0,) * _nd)

    grid_spec = pltpu.PrefetchScalarGridSpec(
        num_scalar_prefetch=0,
        grid=(B, n_q_tiles),
        in_specs=[
            pl.BlockSpec((1, tq, d_embed), lambda b, q: (b, q, 0)),        # x_q tile
            pl.BlockSpec((1, lkv_pad, d_cross), lambda b, q: (b, 0, 0)),   # x_kv per batch
            full_spec(wq_t), full_spec(bq),
            full_spec(wk_t), full_spec(bk),
            full_spec(wv_t), full_spec(bv),
            full_spec(wo_t), full_spec(bo),
        ],
        out_specs=pl.BlockSpec((1, tq, d_embed), lambda b, q: (b, q, 0)),
        scratch_shapes=[
            pltpu.VMEM((lkv_pad, d_embed), jnp.bfloat16),   # cached K (per batch elem)
            pltpu.VMEM((lkv_pad, d_embed), jnp.bfloat16),   # cached V (per batch elem)
            pltpu.VMEM((tq, d_embed), jnp.bfloat16),        # merged per-head context
        ],
    )

    out = pl.pallas_call(
        kernel,
        out_shape=jax.ShapeDtypeStruct((B, lq_pad, d_embed), x_q.dtype),
        grid_spec=grid_spec,
        compiler_params=pltpu.CompilerParams(
            # Batch axis megacore-parallel; q-tile axis sequential so the K/V
            # scratch computed at q==0 is valid for later tiles of the same batch.
            dimension_semantics=("parallel", "arbitrary"),
            vmem_limit_bytes=48 * 1024 * 1024,
        ),
    )(x_q, x_kv, wq_t, bq, wk_t, bk, wv_t, bv, wo_t, bo)

    if lq_pad != Lq:
        out = out[:, :Lq, :]
    return out


def init_params(key, d_embed, d_cross):
    """Deterministic synthetic parameters with PyTorch nn.Linear shapes."""
    ks = jax.random.split(key, 8)

    def lin(kw, kb, out_f, in_f):
        bound = 1.0 / (in_f ** 0.5)
        w = jax.random.uniform(kw, (out_f, in_f), jnp.float32, -bound, bound)
        b = jax.random.uniform(kb, (out_f,), jnp.float32, -bound, bound)
        return w, b

    wq, bq = lin(ks[0], ks[1], d_embed, d_embed)
    wk, bk = lin(ks[2], ks[3], d_embed, d_cross)
    wv, bv = lin(ks[4], ks[5], d_embed, d_cross)
    wo, bo = lin(ks[6], ks[7], d_embed, d_embed)
    return dict(wq=wq, bq=bq, wk=wk, bk=bk, wv=wv, bv=bv, wo=wo, bo=bo)


def cross_attention_ref(x_q, x_kv, params, n_heads):
    """Pure-JAX f32 reference mirroring the PyTorch forward."""
    B, Lq, E = x_q.shape
    dh = E // n_heads
    scale = dh ** -0.5
    q = x_q @ params['wq'].T + params['bq']
    k = x_kv @ params['wk'].T + params['bk']
    v = x_kv @ params['wv'].T + params['bv']
    q = q.reshape(B, -1, n_heads, dh).transpose(0, 2, 1, 3)
    k = k.reshape(B, -1, n_heads, dh).transpose(0, 2, 1, 3)
    v = v.reshape(B, -1, n_heads, dh).transpose(0, 2, 1, 3)
    s = jnp.einsum('bhqd,bhkd->bhqk', q, k) * scale
    w = jax.nn.softmax(s, axis=-1)
    o = jnp.einsum('bhqk,bhkd->bhqd', w, v)
    o = o.transpose(0, 2, 1, 3).reshape(B, Lq, E)
    return o @ params['wo'].T + params['bo']


if __name__ == "__main__":
    B, Lq, Lkv = 2, 16, 8
    n_heads, d_embed, d_cross = 4, 32, 24

    key = jax.random.PRNGKey(0)
    k_xq, k_xkv, k_p = jax.random.split(key, 3)
    x_q = jax.random.normal(k_xq, (B, Lq, d_embed), jnp.float32)
    x_kv = jax.random.normal(k_xkv, (B, Lkv, d_cross), jnp.float32)
    params = init_params(k_p, d_embed, d_cross)

    # tq_max=8 forces two query tiles, exercising the K/V scratch reuse path.
    out = cross_attention(x_q, x_kv, params, n_heads, tq_max=8)
    out = jax.block_until_ready(out)

    ref = cross_attention_ref(x_q, x_kv, params, n_heads)
    assert out.shape == (B, Lq, d_embed)
    # bf16 matmul inputs (f32 accumulation) => relaxed tolerance vs f32 reference.
    assert jnp.allclose(out, ref, atol=5e-2, rtol=5e-2)

    print("KERNEL_OK")
</pallas_src>

<mosaic_0001>
module attributes {stable_mosaic.version = 11 : i64} {
  func.func @cross_attention_kernel(%arg0: i32, %arg1: i32, %arg2: memref<1x8x32xf32, #tpu.memory_space<vmem>>, %arg3: memref<1x128x24xf32, #tpu.memory_space<vmem>>, %arg4: memref<32x32xbf16, #tpu.memory_space<vmem>>, %arg5: memref<1x32xf32, #tpu.memory_space<vmem>>, %arg6: memref<24x32xbf16, #tpu.memory_space<vmem>>, %arg7: memref<1x32xf32, #tpu.memory_space<vmem>>, %arg8: memref<24x32xbf16, #tpu.memory_space<vmem>>, %arg9: memref<1x32xf32, #tpu.memory_space<vmem>>, %arg10: memref<32x32xbf16, #tpu.memory_space<vmem>>, %arg11: memref<1x32xf32, #tpu.memory_space<vmem>>, %arg12: memref<1x8x32xf32, #tpu.memory_space<vmem>>, %arg13: memref<128x32xbf16, #tpu.memory_space<vmem>>, %arg14: memref<128x32xbf16, #tpu.memory_space<vmem>>, %arg15: memref<8x32xbf16, #tpu.memory_space<vmem>>) attributes {dimension_semantics = [#tpu.dimension_semantics<parallel>, #tpu.dimension_semantics<arbitrary>], iteration_bounds = array<i64: 2, 2>, scalar_prefetch = 0 : i64, scratch_operands = 3 : i64, tpu.core_type = #tpu.core_type<tc>, window_params = [{transform_indices = @transform_0, window_bounds = array<i64: 1, 8, 32>}, {transform_indices = @transform_1, window_bounds = array<i64: 1, 128, 24>}, {pipeline_mode = #tpu.pipeline_mode<synchronous>, transform_indices = @transform_2, window_bounds = array<i64: 32, 32>}, {pipeline_mode = #tpu.pipeline_mode<synchronous>, transform_indices = @transform_3, window_bounds = array<i64: 1, 32>}, {pipeline_mode = #tpu.pipeline_mode<synchronous>, transform_indices = @transform_4, window_bounds = array<i64: 24, 32>}, {pipeline_mode = #tpu.pipeline_mode<synchronous>, transform_indices = @transform_5, window_bounds = array<i64: 1, 32>}, {pipeline_mode = #tpu.pipeline_mode<synchronous>, transform_indices = @transform_6, window_bounds = array<i64: 24, 32>}, {pipeline_mode = #tpu.pipeline_mode<synchronous>, transform_indices = @transform_7, window_bounds = array<i64: 1, 32>}, {pipeline_mode = #tpu.pipeline_mode<synchronous>, transform_indices = @transform_8, window_bounds = array<i64: 32, 32>}, {pipeline_mode = #tpu.pipeline_mode<synchronous>, transform_indices = @transform_9, window_bounds = array<i64: 1, 32>}, {transform_indices = @transform_10, window_bounds = array<i64: 1, 8, 32>}]} {
    %c0_i32 = arith.constant 0 : i32
    %0 = arith.cmpi eq, %arg1, %c0_i32 : i32
    %1 = arith.extui %0 : i1 to i32
    %c0_i32_0 = arith.constant 0 : i32
    %2 = arith.cmpi ne, %1, %c0_i32_0 : i32
    scf.if %2 {
      %c0_56 = arith.constant 0 : index
      %c0_57 = arith.constant 0 : index
      %c0_58 = arith.constant 0 : index
      %107 = vector.load %arg3[%c0_56, %c0_57, %c0_58] : memref<1x128x24xf32, #tpu.memory_space<vmem>>, vector<1x128x24xf32>
      %108 = vector.shape_cast %107 : vector<1x128x24xf32> to vector<128x24xf32>
      %109 = arith.truncf %108 : vector<128x24xf32> to vector<128x24xbf16>
      %c0_59 = arith.constant 0 : index
      %c0_60 = arith.constant 0 : index
      %110 = vector.load %arg6[%c0_59, %c0_60] : memref<24x32xbf16, #tpu.memory_space<vmem>>, vector<24x32xbf16>
      %cst_61 = arith.constant dense<0.000000e+00> : vector<128x32xf32>
      %111 = tpu.matmul %109, %110, %cst_61 {dimension_numbers = #tpu.dot_dimension_numbers<[1], [0], [0], [1], [0, 0, 1, 1], [], []>} : vector<128x24xbf16>, vector<24x32xbf16>, vector<128x32xf32> -> vector<128x32xf32>
      %c0_62 = arith.constant 0 : index
      %c0_63 = arith.constant 0 : index
      %112 = vector.load %arg7[%c0_62, %c0_63] : memref<1x32xf32, #tpu.memory_space<vmem>>, vector<1x32xf32>
      %113 = vector.broadcast %112 : vector<1x32xf32> to vector<128x32xf32>
      %114 = arith.addf %111, %113 : vector<128x32xf32>
      %c0_64 = arith.constant 0 : index
      %c0_65 = arith.constant 0 : index
      %115 = vector.load %arg8[%c0_64, %c0_65] : memref<24x32xbf16, #tpu.memory_space<vmem>>, vector<24x32xbf16>
      %cst_66 = arith.constant dense<0.000000e+00> : vector<128x32xf32>
      %116 = tpu.matmul %109, %115, %cst_66 {dimension_numbers = #tpu.dot_dimension_numbers<[1], [0], [0], [1], [0, 0, 1, 1], [], []>} : vector<128x24xbf16>, vector<24x32xbf16>, vector<128x32xf32> -> vector<128x32xf32>
      %c0_67 = arith.constant 0 : index
      %c0_68 = arith.constant 0 : index
      %117 = vector.load %arg9[%c0_67, %c0_68] : memref<1x32xf32, #tpu.memory_space<vmem>>, vector<1x32xf32>
      %118 = vector.broadcast %117 : vector<1x32xf32> to vector<128x32xf32>
      %119 = arith.addf %116, %118 : vector<128x32xf32>
      %120 = arith.truncf %114 : vector<128x32xf32> to vector<128x32xbf16>
      %c0_69 = arith.constant 0 : index
      %c0_70 = arith.constant 0 : index
      %121 = vector.load %arg13[%c0_69, %c0_70] : memref<128x32xbf16, #tpu.memory_space<vmem>>, vector<128x32xbf16>
      tpu.vector_store %arg13[%c0_69, %c0_70], %120 {strides = array<i32>} : memref<128x32xbf16, #tpu.memory_space<vmem>>, vector<128x32xbf16>,
      %122 = arith.truncf %119 : vector<128x32xf32> to vector<128x32xbf16>
      %c0_71 = arith.constant 0 : index
      %c0_72 = arith.constant 0 : index
      %123 = vector.load %arg14[%c0_71, %c0_72] : memref<128x32xbf16, #tpu.memory_space<vmem>>, vector<128x32xbf16>
      tpu.vector_store %arg14[%c0_71, %c0_72], %122 {strides = array<i32>} : memref<128x32xbf16, #tpu.memory_space<vmem>>, vector<128x32xbf16>,
    } else {
    }
    %c0 = arith.constant 0 : index
    %c0_1 = arith.constant 0 : index
    %c0_2 = arith.constant 0 : index
    %3 = vector.load %arg2[%c0, %c0_1, %c0_2] : memref<1x8x32xf32, #tpu.memory_space<vmem>>, vector<1x8x32xf32>
    %4 = vector.shape_cast %3 : vector<1x8x32xf32> to vector<8x32xf32>
    %5 = arith.truncf %4 : vector<8x32xf32> to vector<8x32xbf16>
    %c0_3 = arith.constant 0 : index
    %c0_4 = arith.constant 0 : index
    %6 = vector.load %arg4[%c0_3, %c0_4] : memref<32x32xbf16, #tpu.memory_space<vmem>>, vector<32x32xbf16>
    %cst = arith.constant dense<0.000000e+00> : vector<8x32xf32>
    %7 = tpu.matmul %5, %6, %cst {dimension_numbers = #tpu.dot_dimension_numbers<[1], [0], [0], [1], [0, 0, 1, 1], [], []>} : vector<8x32xbf16>, vector<32x32xbf16>, vector<8x32xf32> -> vector<8x32xf32>
    %c0_5 = arith.constant 0 : index
    %c0_6 = arith.constant 0 : index
    %8 = vector.load %arg5[%c0_5, %c0_6] : memref<1x32xf32, #tpu.memory_space<vmem>>, vector<1x32xf32>
    %9 = vector.broadcast %8 : vector<1x32xf32> to vector<8x32xf32>
    %10 = arith.addf %7, %9 : vector<8x32xf32>
    %11 = arith.truncf %10 : vector<8x32xf32> to vector<8x32xbf16>
    %12 = tpu.iota {dimensions = array<i32: 1>} : vector<1x128xi32>
    %c8_i32 = arith.constant 8 : i32
    %13 = vector.broadcast %c8_i32 : i32 to vector<1x128xi32>
    %14 = arith.cmpi slt, %12, %13 : vector<1x128xi32>
    %cst_7 = arith.constant 0.000000e+00 : f32
    %cst_8 = arith.constant -1.000000e+30 : f32
    %15 = vector.broadcast %cst_7 : f32 to vector<1x128xf32>
    %16 = vector.broadcast %cst_8 : f32 to vector<1x128xf32>
    %17 = arith.select %14, %15, %16 : vector<1x128xi1>, vector<1x128xf32>
    %18 = vector.extract_strided_slice %11 {offsets = [0, 0], sizes = [8, 8], strides = [1, 1]} : vector<8x32xbf16> to vector<8x8xbf16>
    %c0_9 = arith.constant 0 : index
    %c0_10 = arith.constant 0 : index
    %19 = vector.load %arg13[%c0_9, %c0_10] : memref<128x32xbf16, #tpu.memory_space<vmem>>, vector<128x8xbf16>
    %c0_11 = arith.constant 0 : index
    %c0_12 = arith.constant 0 : index
    %20 = vector.load %arg14[%c0_11, %c0_12] : memref<128x32xbf16, #tpu.memory_space<vmem>>, vector<128x8xbf16>
    %cst_13 = arith.constant dense<0.000000e+00> : vector<8x128xf32>
    %21 = tpu.matmul %18, %19, %cst_13 {dimension_numbers = #tpu.dot_dimension_numbers<[1], [1], [0], [0], [0, 0, 1, 0], [], []>} : vector<8x8xbf16>, vector<128x8xbf16>, vector<8x128xf32> -> vector<8x128xf32>
    %22 = vector.broadcast %17 : vector<1x128xf32> to vector<8x128xf32>
    %23 = arith.addf %21, %22 : vector<8x128xf32>
    %cst_14 = arith.constant dense<0xFF800000> : vector<8xf32>
    %24 = vector.multi_reduction <maximumf>, %23, %cst_14 [1] : vector<8x128xf32> to vector<8xf32>
    %25 = vector.shape_cast %24 : vector<8xf32> to vector<8x1xf32>
    %26 = vector.broadcast %25 : vector<8x1xf32> to vector<8x128xf32>
    %27 = arith.subf %23, %26 : vector<8x128xf32>
    %28 = math.exp %27 : vector<8x128xf32>
    %cst_15 = arith.constant dense<0.000000e+00> : vector<8xf32>
    %29 = vector.multi_reduction <add>, %28, %cst_15 [1] : vector<8x128xf32> to vector<8xf32>
    %30 = vector.shape_cast %29 : vector<8xf32> to vector<8x1xf32>
    %31 = arith.truncf %28 : vector<8x128xf32> to vector<8x128xbf16>
    %cst_16 = arith.constant dense<0.000000e+00> : vector<8x8xf32>
    %32 = tpu.matmul %31, %20, %cst_16 {dimension_numbers = #tpu.dot_dimension_numbers<[1], [0], [0], [1], [0, 0, 1, 1], [], []>} : vector<8x128xbf16>, vector<128x8xbf16>, vector<8x8xf32> -> vector<8x8xf32>
    %33 = tpu.reciprocal %30 {approx = true} : vector<8x1xf32> -> vector<8x1xf32>
    %34 = vector.broadcast %33 : vector<8x1xf32> to vector<8x8xf32>
    %35 = arith.mulf %32, %34 : vector<8x8xf32>
    %36 = arith.truncf %35 : vector<8x8xf32> to vector<8x8xbf16>
    %c0_17 = arith.constant 0 : index
    %c0_18 = arith.constant 0 : index
    %37 = vector.load %arg15[%c0_17, %c0_18] : memref<8x32xbf16, #tpu.memory_space<vmem>>, vector<8x8xbf16>
    tpu.vector_store %arg15[%c0_17, %c0_18], %36 {strides = array<i32>} : memref<8x32xbf16, #tpu.memory_space<vmem>>, vector<8x8xbf16>,
    %38 = vector.extract_strided_slice %11 {offsets = [0, 8], sizes = [8, 8], strides = [1, 1]} : vector<8x32xbf16> to vector<8x8xbf16>
    %c0_19 = arith.constant 0 : index
    %c8 = arith.constant 8 : index
    %39 = vector.load %arg13[%c0_19, %c8] : memref<128x32xbf16, #tpu.memory_space<vmem>>, vector<128x8xbf16>
    %c0_20 = arith.constant 0 : index
    %c8_21 = arith.constant 8 : index
    %40 = vector.load %arg14[%c0_20, %c8_21] : memref<128x32xbf16, #tpu.memory_space<vmem>>, vector<128x8xbf16>
    %cst_22 = arith.constant dense<0.000000e+00> : vector<8x128xf32>
    %41 = tpu.matmul %38, %39, %cst_22 {dimension_numbers = #tpu.dot_dimension_numbers<[1], [1], [0], [0], [0, 0, 1, 0], [], []>} : vector<8x8xbf16>, vector<128x8xbf16>, vector<8x128xf32> -> vector<8x128xf32>
    %42 = vector.broadcast %17 : vector<1x128xf32> to vector<8x128xf32>
    %43 = arith.addf %41, %42 : vector<8x128xf32>
    %cst_23 = arith.constant dense<0xFF800000> : vector<8xf32>
    %44 = vector.multi_reduction <maximumf>, %43, %cst_23 [1] : vector<8x128xf32> to vector<8xf32>
    %45 = vector.shape_cast %44 : vector<8xf32> to vector<8x1xf32>
    %46 = vector.broadcast %45 : vector<8x1xf32> to vector<8x128xf32>
    %47 = arith.subf %43, %46 : vector<8x128xf32>
    %48 = math.exp %47 : vector<8x128xf32>
    %cst_24 = arith.constant dense<0.000000e+00> : vector<8xf32>
    %49 = vector.multi_reduction <add>, %48, %cst_24 [1] : vector<8x128xf32> to vector<8xf32>
    %50 = vector.shape_cast %49 : vector<8xf32> to vector<8x1xf32>
    %51 = arith.truncf %48 : vector<8x128xf32> to vector<8x128xbf16>
    %cst_25 = arith.constant dense<0.000000e+00> : vector<8x8xf32>
    %52 = tpu.matmul %51, %40, %cst_25 {dimension_numbers = #tpu.dot_dimension_numbers<[1], [0], [0], [1], [0, 0, 1, 1], [], []>} : vector<8x128xbf16>, vector<128x8xbf16>, vector<8x8xf32> -> vector<8x8xf32>
    %53 = tpu.reciprocal %50 {approx = true} : vector<8x1xf32> -> vector<8x1xf32>
    %54 = vector.broadcast %53 : vector<8x1xf32> to vector<8x8xf32>
    %55 = arith.mulf %52, %54 : vector<8x8xf32>
    %56 = arith.truncf %55 : vector<8x8xf32> to vector<8x8xbf16>
    %c0_26 = arith.constant 0 : index
    %c8_27 = arith.constant 8 : index
    %57 = vector.load %arg15[%c0_26, %c8_27] : memref<8x32xbf16, #tpu.memory_space<vmem>>, vector<8x8xbf16>
    tpu.vector_store %arg15[%c0_26, %c8_27], %56 {strides = array<i32>} : memref<8x32xbf16, #tpu.memory_space<vmem>>, vector<8x8xbf16>,
    %58 = vector.extract_strided_slice %11 {offsets = [0, 16], sizes = [8, 8], strides = [1, 1]} : vector<8x32xbf16> to vector<8x8xbf16>
    %c0_28 = arith.constant 0 : index
    %c16 = arith.constant 16 : index
    %59 = vector.load %arg13[%c0_28, %c16] : memref<128x32xbf16, #tpu.memory_space<vmem>>, vector<128x8xbf16>
    %c0_29 = arith.constant 0 : index
    %c16_30 = arith.constant 16 : index
    %60 = vector.load %arg14[%c0_29, %c16_30] : memref<128x32xbf16, #tpu.memory_space<vmem>>, vector<128x8xbf16>
    %cst_31 = arith.constant dense<0.000000e+00> : vector<8x128xf32>
    %61 = tpu.matmul %58, %59, %cst_31 {dimension_numbers = #tpu.dot_dimension_numbers<[1], [1], [0], [0], [0, 0, 1, 0], [], []>} : vector<8x8xbf16>, vector<128x8xbf16>, vector<8x128xf32> -> vector<8x128xf32>
    %62 = vector.broadcast %17 : vector<1x128xf32> to vector<8x128xf32>
    %63 = arith.addf %61, %62 : vector<8x128xf32>
    %cst_32 = arith.constant dense<0xFF800000> : vector<8xf32>
    %64 = vector.multi_reduction <maximumf>, %63, %cst_32 [1] : vector<8x128xf32> to vector<8xf32>
    %65 = vector.shape_cast %64 : vector<8xf32> to vector<8x1xf32>
    %66 = vector.broadcast %65 : vector<8x1xf32> to vector<8x128xf32>
    %67 = arith.subf %63, %66 : vector<8x128xf32>
    %68 = math.exp %67 : vector<8x128xf32>
    %cst_33 = arith.constant dense<0.000000e+00> : vector<8xf32>
    %69 = vector.multi_reduction <add>, %68, %cst_33 [1] : vector<8x128xf32> to vector<8xf32>
    %70 = vector.shape_cast %69 : vector<8xf32> to vector<8x1xf32>
    %71 = arith.truncf %68 : vector<8x128xf32> to vector<8x128xbf16>
    %cst_34 = arith.constant dense<0.000000e+00> : vector<8x8xf32>
    %72 = tpu.matmul %71, %60, %cst_34 {dimension_numbers = #tpu.dot_dimension_numbers<[1], [0], [0], [1], [0, 0, 1, 1], [], []>} : vector<8x128xbf16>, vector<128x8xbf16>, vector<8x8xf32> -> vector<8x8xf32>
    %73 = tpu.reciprocal %70 {approx = true} : vector<8x1xf32> -> vector<8x1xf32>
    %74 = vector.broadcast %73 : vector<8x1xf32> to vector<8x8xf32>
    %75 = arith.mulf %72, %74 : vector<8x8xf32>
    %76 = arith.truncf %75 : vector<8x8xf32> to vector<8x8xbf16>
    %c0_35 = arith.constant 0 : index
    %c16_36 = arith.constant 16 : index
    %77 = vector.load %arg15[%c0_35, %c16_36] : memref<8x32xbf16, #tpu.memory_space<vmem>>, vector<8x8xbf16>
    tpu.vector_store %arg15[%c0_35, %c16_36], %76 {strides = array<i32>} : memref<8x32xbf16, #tpu.memory_space<vmem>>, vector<8x8xbf16>,
    %78 = vector.extract_strided_slice %11 {offsets = [0, 24], sizes = [8, 8], strides = [1, 1]} : vector<8x32xbf16> to vector<8x8xbf16>
    %c0_37 = arith.constant 0 : index
    %c24 = arith.constant 24 : index
    %79 = vector.load %arg13[%c0_37, %c24] : memref<128x32xbf16, #tpu.memory_space<vmem>>, vector<128x8xbf16>
    %c0_38 = arith.constant 0 : index
    %c24_39 = arith.constant 24 : index
    %80 = vector.load %arg14[%c0_38, %c24_39] : memref<128x32xbf16, #tpu.memory_space<vmem>>, vector<128x8xbf16>
    %cst_40 = arith.constant dense<0.000000e+00> : vector<8x128xf32>
    %81 = tpu.matmul %78, %79, %cst_40 {dimension_numbers = #tpu.dot_dimension_numbers<[1], [1], [0], [0], [0, 0, 1, 0], [], []>} : vector<8x8xbf16>, vector<128x8xbf16>, vector<8x128xf32> -> vector<8x128xf32>
    %82 = vector.broadcast %17 : vector<1x128xf32> to vector<8x128xf32>
    %83 = arith.addf %81, %82 : vector<8x128xf32>
    %cst_41 = arith.constant dense<0xFF800000> : vector<8xf32>
    %84 = vector.multi_reduction <maximumf>, %83, %cst_41 [1] : vector<8x128xf32> to vector<8xf32>
    %85 = vector.shape_cast %84 : vector<8xf32> to vector<8x1xf32>
    %86 = vector.broadcast %85 : vector<8x1xf32> to vector<8x128xf32>
    %87 = arith.subf %83, %86 : vector<8x128xf32>
    %88 = math.exp %87 : vector<8x128xf32>
    %cst_42 = arith.constant dense<0.000000e+00> : vector<8xf32>
    %89 = vector.multi_reduction <add>, %88, %cst_42 [1] : vector<8x128xf32> to vector<8xf32>
    %90 = vector.shape_cast %89 : vector<8xf32> to vector<8x1xf32>
    %91 = arith.truncf %88 : vector<8x128xf32> to vector<8x128xbf16>
    %cst_43 = arith.constant dense<0.000000e+00> : vector<8x8xf32>
    %92 = tpu.matmul %91, %80, %cst_43 {dimension_numbers = #tpu.dot_dimension_numbers<[1], [0], [0], [1], [0, 0, 1, 1], [], []>} : vector<8x128xbf16>, vector<128x8xbf16>, vector<8x8xf32> -> vector<8x8xf32>
    %93 = tpu.reciprocal %90 {approx = true} : vector<8x1xf32> -> vector<8x1xf32>
    %94 = vector.broadcast %93 : vector<8x1xf32> to vector<8x8xf32>
    %95 = arith.mulf %92, %94 : vector<8x8xf32>
    %96 = arith.truncf %95 : vector<8x8xf32> to vector<8x8xbf16>
    %c0_44 = arith.constant 0 : index
    %c24_45 = arith.constant 24 : index
    %97 = vector.load %arg15[%c0_44, %c24_45] : memref<8x32xbf16, #tpu.memory_space<vmem>>, vector<8x8xbf16>
    tpu.vector_store %arg15[%c0_44, %c24_45], %96 {strides = array<i32>} : memref<8x32xbf16, #tpu.memory_space<vmem>>, vector<8x8xbf16>,
    %c0_46 = arith.constant 0 : index
    %c0_47 = arith.constant 0 : index
    %98 = vector.load %arg15[%c0_46, %c0_47] : memref<8x32xbf16, #tpu.memory_space<vmem>>, vector<8x32xbf16>
    %c0_48 = arith.constant 0 : index
    %c0_49 = arith.constant 0 : index
    %99 = vector.load %arg10[%c0_48, %c0_49] : memref<32x32xbf16, #tpu.memory_space<vmem>>, vector<32x32xbf16>
    %cst_50 = arith.constant dense<0.000000e+00> : vector<8x32xf32>
    %100 = tpu.matmul %98, %99, %cst_50 {dimension_numbers = #tpu.dot_dimension_numbers<[1], [0], [0], [1], [0, 0, 1, 1], [], []>} : vector<8x32xbf16>, vector<32x32xbf16>, vector<8x32xf32> -> vector<8x32xf32>
    %c0_51 = arith.constant 0 : index
    %c0_52 = arith.constant 0 : index
    %101 = vector.load %arg11[%c0_51, %c0_52] : memref<1x32xf32, #tpu.memory_space<vmem>>, vector<1x32xf32>
    %102 = vector.broadcast %101 : vector<1x32xf32> to vector<8x32xf32>
    %103 = arith.addf %100, %102 : vector<8x32xf32>
    %c0_53 = arith.constant 0 : index
    %c0_54 = arith.constant 0 : index
    %c0_55 = arith.constant 0 : index
    %104 = vector.load %arg12[%c0_53, %c0_54, %c0_55] : memref<1x8x32xf32, #tpu.memory_space<vmem>>, vector<1x8x32xf32>
    %105 = vector.shape_cast %104 : vector<1x8x32xf32> to vector<8x32xf32>
    %106 = vector.shape_cast %103 : vector<8x32xf32> to vector<1x8x32xf32>
    tpu.vector_store %arg12[%c0_53, %c0_54, %c0_55], %106 {strides = array<i32>} : memref<1x8x32xf32, #tpu.memory_space<vmem>>, vector<1x8x32xf32>,
    return
  }
  func.func @transform_0(%arg0: i32, %arg1: i32) -> (i32, i32, i32) {
    %c0_i32 = arith.constant 0 : i32
    %c0_i32_0 = arith.constant 0 : i32
    return %arg0, %arg1, %c0_i32 : i32, i32, i32
  }
  func.func @transform_1(%arg0: i32, %arg1: i32) -> (i32, i32, i32) {
    %c0_i32 = arith.constant 0 : i32
    %c0_i32_0 = arith.constant 0 : i32
    %c0_i32_1 = arith.constant 0 : i32
    return %arg0, %c0_i32, %c0_i32_0 : i32, i32, i32
  }
  func.func @transform_2(%arg0: i32, %arg1: i32) -> (i32, i32) {
    %c0_i32 = arith.constant 0 : i32
    %c0_i32_0 = arith.constant 0 : i32
    %c0_i32_1 = arith.constant 0 : i32
    return %c0_i32, %c0_i32_0 : i32, i32
  }
  func.func @transform_3(%arg0: i32, %arg1: i32) -> (i32, i32) {
    %c0_i32 = arith.constant 0 : i32
    %c0_i32_0 = arith.constant 0 : i32
    %c0_i32_1 = arith.constant 0 : i32
    return %c0_i32, %c0_i32_0 : i32, i32
  }
  func.func @transform_4(%arg0: i32, %arg1: i32) -> (i32, i32) {
    %c0_i32 = arith.constant 0 : i32
    %c0_i32_0 = arith.constant 0 : i32
    %c0_i32_1 = arith.constant 0 : i32
    return %c0_i32, %c0_i32_0 : i32, i32
  }
  func.func @transform_5(%arg0: i32, %arg1: i32) -> (i32, i32) {
    %c0_i32 = arith.constant 0 : i32
    %c0_i32_0 = arith.constant 0 : i32
    %c0_i32_1 = arith.constant 0 : i32
    return %c0_i32, %c0_i32_0 : i32, i32
  }
  func.func @transform_6(%arg0: i32, %arg1: i32) -> (i32, i32) {
    %c0_i32 = arith.constant 0 : i32
    %c0_i32_0 = arith.constant 0 : i32
    %c0_i32_1 = arith.constant 0 : i32
    return %c0_i32, %c0_i32_0 : i32, i32
  }
  func.func @transform_7(%arg0: i32, %arg1: i32) -> (i32, i32) {
    %c0_i32 = arith.constant 0 : i32
    %c0_i32_0 = arith.constant 0 : i32
    %c0_i32_1 = arith.constant 0 : i32
    return %c0_i32, %c0_i32_0 : i32, i32
  }
  func.func @transform_8(%arg0: i32, %arg1: i32) -> (i32, i32) {
    %c0_i32 = arith.constant 0 : i32
    %c0_i32_0 = arith.constant 0 : i32
    %c0_i32_1 = arith.constant 0 : i32
    return %c0_i32, %c0_i32_0 : i32, i32
  }
  func.func @transform_9(%arg0: i32, %arg1: i32) -> (i32, i32) {
    %c0_i32 = arith.constant 0 : i32
    %c0_i32_0 = arith.constant 0 : i32
    %c0_i32_1 = arith.constant 0 : i32
    return %c0_i32, %c0_i32_0 : i32, i32
  }
  func.func @transform_10(%arg0: i32, %arg1: i32) -> (i32, i32, i32) {
    %c0_i32 = arith.constant 0 : i32
    %c0_i32_0 = arith.constant 0 : i32
    return %arg0, %arg1, %c0_i32 : i32, i32, i32
  }
}

</mosaic_0001>

<bundles_post_ra>
// kernel: tpu_custom_call.1
= control target key start
LH: loop header
LB: loop body
LE: loop exit
PB: predicated region body
PF: predicated region fallthrough
CT: control target
= control target key end

     0   :  { %15 = vsyncpa [#allocation6], 0  ;;  %s2760_s0 = inlined_call_operand.vmem [shape: f32[2,16,32], index: 0, kind: input, shape index: {}]   ;;  %s2761_s1 = inlined_call_operand.vmem [shape: f32[2,128,24], index: 1, kind: input, shape index: {}]   ;;  %s2762_s2 = inlined_call_operand.vmem [shape: bf16[32,32], index: 2, kind: input, shape index: {}]   ;;  %s2763_s3 = inlined_call_operand.vmem [shape: f32[1,32], index: 3, kind: input, shape index: {}]   ;;  %s2764_s4 = inlined_call_operand.vmem [shape: bf16[24,32], index: 4, kind: input, shape index: {}]   ;;  %s2765_s5 = inlined_call_operand.vmem [shape: f32[1,32], index: 5, kind: input, shape index: {}]   ;;  %s2766_s6 = inlined_call_operand.vmem [shape: bf16[24,32], index: 6, kind: input, shape index: {}]   ;;  %s2767_s7 = inlined_call_operand.vmem [shape: f32[1,32], index: 7, kind: input, shape index: {}]   ;;  %s2768_s8 = inlined_call_operand.vmem [shape: bf16[32,32], index: 8, kind: input, shape index: {}]   ;;  %s2769_s9 = inlined_call_operand.vmem [shape: f32[1,32], index: 9, kind: input, shape index: {}]   ;;  %s2770_s10 = inlined_call_operand.hbm [shape: f32[2,16,32], index: 10, kind: output, shape index: {}]  }
   0x1   :  { %17 = vsyncpa [#allocation6 + $0x1], 0  ;;  %s2360_s13 = smov 0   ;;  %s2362_s14 = smov 0  }
   0x2   :  { %s2364_s15 = smov 0   ;;  %s2366_s16 = smov 0  }
   0x3   :  { %s2368_s17 = smov 0   ;;  %s2370_s18 = smov 0  }
   0x4   :  { %s2372_s19 = smov 0   ;;  %s2374_s20 = smov 0  }
   0x5 LB: > { %2781 = sst [smem:[#allocation8_spill]] %s2268_s13  ;;  %s1711_s21 = sadd.s32 4294967295, %s2296_s20   ;;  %s2296_s20 = sphi %s2374_s20, %s23_s20   ;;  %s2292_s19 = sphi %s2372_s19, %s2801_s19   ;;  %s2288_s18 = sphi %s2370_s18, %s2800_s18   ;;  %s2284_s17 = sphi %s2368_s17, %s2799_s17   ;;  %s2280_s16 = sphi %s2366_s16, %s2804_s16   ;;  %s2276_s15 = sphi %s2364_s15, %s2797_s15   ;;  %s2272_s14 = sphi %s2362_s14, %s2803_s14   ;;  %s2268_s13 = sphi %s2360_s13, %s2802_s13  }
   0x6   : > { %2782 = sst [smem:[#allocation9_spill]] %s2276_s15  ;;  %s1712_s22 = sadd.s32 4294967294, %s2296_s20  }
   0x7   : > { %2783 = sst [smem:[#allocation10_spill]] %s2288_s18  ;;  %s32_s23 = sadd.s32 1, %s2288_s18 }
   0x8   : > { %2784 = sst [smem:[#allocation11_spill]] %s2292_s19  ;;  %p33_p0 = scmp.ge.s32.totalorder %s32_s23, 2 }
   0x9   : > { %2785 = sst [smem:[#allocation12_spill]] %s2296_s20  ;;  %s35_s24 = sadd.s32 1, %s2292_s19 }
   0xa   : > { %p276_p1 = scmp.ne.s32.totalorder %s2276_s15, %s2272_s14  ;;  %p277_p2 = scmp.eq.s32.totalorder %s1711_s21, 3 }
   0xb   : > { %s2806_s23 = smov (%p33_p0, %s32_s23), 0  ;;  %s2808_s24 = smov (!%p33_p0, %s35_s24), %s2292_s19 }
   0xc   : > { %2786 = sst [smem:[#allocation13_spill]] %s2806_s23  ;;  %s262_s25 = ssub.s32 %s2288_s18, %s2806_s23 }
   0xd   : > { %p2411_p3 = por %p277_p2, %p276_p1  ;;  %p37_p4 = scmp.ge.s32.totalorder %s2808_s24, 2 }
   0xe   : > { %p282_p5 = scmp.ne.s32.totalorder %s2272_s14, %s2268_s13  ;;  %p283_p6 = scmp.eq.s32.totalorder %s1712_s22, 3 }
   0xf   : > { %p1715_p7 = scmp.ge.s32.totalorder %s2296_s20, 1  ;;  %s2810_s24 = smov (%p37_p4, %s2808_s24), 0 }
  0x10   : > { %2788 = sst [smem:[#allocation14_spill]] %s2810_s24  ;;  %p2420_p8 = por %p283_p6, %p282_p5 }
  0x11   : > { %p344_p9 = scmp.lt.s32.totalorder %s2296_s20, 5  ;;  %s261_s28 = ssub.s32 %s2292_s19, %s2810_s24 }
  0x12   : > { %s2789_s27 = scalar_select %p2420_p8, 1, 0 }
  0x13   : > { %s266_s29 = sadd.s32 1, %s2276_s15  ;;  %s263_s30 = sor.u32 %s262_s25, %s261_s28 }
  0x14   : > { %2790 = sst [smem:[#allocation15_spill]] %s2789_s27  ;;  %p345_p10 = pnand %p1715_p7, %p344_p9 }
  0x15   : > { %p264_p11 = scmp.eq.s32.totalorder %s263_s30, 0  ;;  %s2777_s12 = sand.u32 (!%p345_p10), 1, %s2272_s14  }
  0x16   : > { %348 = sbr.rel (%p345_p10) target bundleno = 1305 (0x519), region = 60  ;;  %p390_p12 = scmp.lt.s32.totalorder (!%p345_p10), %s2284_s17, 1 }
  0x17   : > { %s2429_s11 = scalar_select %p264_p11, %s2276_s15, %s266_s29  }
  0x18   : > { %s2435_s21 = sshll.u32 (!%p345_p10), %s2777_s12, 3  ;;  %p392_p13 = scmp.lt.s32.totalorder (!%p345_p10), %s2280_s16, 1 }
  0x19   : > { %2791 = sst [smem:[#allocation16_spill]] %s2429_s11  ;;  %s389_s12 = scalar_lea.vmem (!%p345_p10), [#allocation5], %s2435_s21 }
  0x1a   : > { %p1721_p0 = scmp.ne.s32.totalorder (!%p345_p10), %s2280_s16, 0 }
  0x1b   : > { %s391_s22 = scalar_select %p390_p12, %s2284_s17, 1 }
  0x1c   : > { %s393_s25 = scalar_select %p392_p13, %s2280_s16, 1 }
  0x1d   : > { %s1717_s28 = sshll.u32 %s391_s22, 1  ;;  %s2029_s30 = sshll.u32 %s391_s22, 7 }
  0x1e   : > { %s395_s29 = sadd.s32 %s1717_s28, %s393_s25  ;;  %s2443_s19 = scalar_lea.vmem %s2761_s1, %s2029_s30 }
  0x1f   : > { %s1718_s18 = sshll.u32 %s395_s29, 3  ;;  %407 = sbr.rel (%p1721_p0) target bundleno = 243 (0xf3), region = 64 }
  0x20   : > { %s2448_s27 = scalar_lea.vmem %s2760_s0, %s1718_s18 }
  0x24   : > { %v434_v0 = vld [vmem:[%s2764_s4 + $0x8] sm:$0xf]  ;;  %vm473_vm0 = vcmask 1043456   ;;  %v2030_v8 = vld [vmem:[%s2764_s4] sm:$0xff]  ;;  %vm448_vm1 = vcmask 195584   ;;  %v410_v16 = vld [vmem:[%s2443_s19 + $0x10] sm:$0xff] }
  0x25   : > { %v528_v1 = vld [vmem:[%s2766_s6 + $0x8] sm:$0xf]  ;;  %v444_v2 = vunpack.c.l.b16 %v434_v0  ;;  %v408_v9 = vld [vmem:[%s2443_s19] sm:$0xff]  ;;  %v411_v17 = vld [vmem:[%s2443_s19 + $0x18] sm:$0xff]  ;;  %vm610_vm2 = vcmask 257024  }
  0x26   : > { %v538_v3 = vunpack.c.l.b16 %v528_v1  ;;  %v409_v10 = vld [vmem:[%s2443_s19 + $0x8] sm:$0xff]  ;;  %v416_v11 = vld [vmem:[%s2443_s19 + $0x40] sm:$0xff]  ;;  %v418_v18 = vld [vmem:[%s2443_s19 + $0x50] sm:$0xff]  ;;  %v425_v20 = vpack.c.bf16 %v411_v17, %v410_v16 }
  0x27   : > { %v446_v4 = vpack.c.b16 %v444_v2, %v444_v2  ;;  %v417_v12 = vld [vmem:[%s2443_s19 + $0x48] sm:$0xff]  ;;  %v2031_v13 = vld [vmem:[%s2766_s6] sm:$0xff]  ;;  %v424_v14 = vpack.c.bf16 %v409_v10, %v408_v9  ;;  %v419_v19 = vld [vmem:[%s2443_s19 + $0x58] sm:$0xff] }
  0x28   : > { %v540_v5 = vpack.c.b16 %v538_v3, %v538_v3  ;;  %v428_v15 = vpack.c.bf16 %v417_v12, %v416_v11  ;;  %v429_v21 = vpack.c.bf16 %v419_v19, %v418_v18  ;;  %v412_v22 = vld [vmem:[%s2443_s19 + $0x20] sm:$0xff]  ;;  %v413_v23 = vld [vmem:[%s2443_s19 + $0x28] sm:$0xff]  ;;  %v414_v28 = vld [vmem:[%s2443_s19 + $0x30] sm:$0xff] }
  0x29   : > { %v475_v6 = vsel %vm473_vm0, %v446_v4, 0  ;;  %v420_v24 = vld [vmem:[%s2443_s19 + $0x60] sm:$0xff]  ;;  %v421_v25 = vld [vmem:[%s2443_s19 + $0x68] sm:$0xff]  ;;  %v426_v26 = vpack.c.bf16 %v413_v23, %v412_v22  ;;  %v415_v29 = vld [vmem:[%s2443_s19 + $0x38] sm:$0xff] }
  0x2a   : > { %v543_v7 = vsel %vm473_vm0, %v540_v5, 0  ;;  %483 = vmatpush.bf16.msra.mxu0 %v475_v6  ;;  %2100 = vmatpush.bf16.msra.mxu2 %v475_v6  ;;  %v430_v27 = vpack.c.bf16 %v421_v25, %v420_v24  ;;  %v422_v30 = vld [vmem:[%s2443_s19 + $0x70] sm:$0xff]  ;;  %v423_v31 = vld [vmem:[%s2443_s19 + $0x78] sm:$0xff]  ;;  %v427_v32 = vpack.c.bf16 %v415_v29, %v414_v28  ;;  %v2499_v34 = vld [vmem:[%s2765_s5] ss:$0 sm:$0xff] }
  0x2b   : > { %551 = vmatpush.bf16.msra.mxu1 %v543_v7  ;;  %2102 = vmatpush.bf16.msra.mxu3 %v543_v7  ;;  %v431_v33 = vpack.c.bf16 %v423_v31, %v422_v30  ;;  %v2504_v35 = vld [vmem:[%s2767_s7] ss:$0 sm:$0xff] }
  0x2e   : > { %484 = vmatpush.bf16.msra.mxu0 %v2030_v8  ;;  %2101 = vmatpush.bf16.msra.mxu2 %v2030_v8 }
  0x2f   : > { %552 = vmatpush.bf16.msra.mxu1 %v2031_v13  ;;  %2103 = vmatpush.bf16.msra.mxu3 %v2031_v13 }
  0x31   : > { %1726 = vmatmul.msk.bf16.vlgmr.msra.gmra.mxu0 %vm448_vm1, %v424_v14  ;;  %1730 = vmatmul.msk.bf16.vlgmr.msra.gmra.mxu2 %vm448_vm1, %v428_v15 }
  0x32   : > { %1738 = vmatmul.msk.bf16.vlgmr.msra.gmra.mxu1 %vm448_vm1, %v424_v14  ;;  %1742 = vmatmul.msk.bf16.vlgmr.msra.gmra.mxu3 %vm448_vm1, %v428_v15 }
  0x41   : > { %1727 = vmatmul.msk.bf16.gmra.mxu0 %vm448_vm1, %v425_v20  ;;  %1731 = vmatmul.msk.bf16.gmra.mxu2 %vm448_vm1, %v429_v21 }
  0x42   : > { %1739 = vmatmul.msk.bf16.gmra.mxu1 %vm448_vm1, %v425_v20  ;;  %1743 = vmatmul.msk.bf16.gmra.mxu3 %vm448_vm1, %v429_v21 }
  0x51   : > { %1728 = vmatmul.msk.bf16.gmra.mxu0 %vm448_vm1, %v426_v26  ;;  %1732 = vmatmul.msk.bf16.gmra.mxu2 %vm448_vm1, %v430_v27 }
  0x52   : > { %1740 = vmatmul.msk.bf16.gmra.mxu1 %vm448_vm1, %v426_v26  ;;  %1744 = vmatmul.msk.bf16.gmra.mxu3 %vm448_vm1, %v430_v27 }
  0x61   : > { %1729 = vmatmul.msk.bf16.gmra.mxu0 %vm448_vm1, %v427_v32  ;;  %1733 = vmatmul.msk.bf16.gmra.mxu2 %vm448_vm1, %v431_v33 }
  0x62   : > { %1741 = vmatmul.msk.bf16.gmra.mxu1 %vm448_vm1, %v427_v32  ;;  %1745 = vmatmul.msk.bf16.gmra.mxu3 %vm448_vm1, %v431_v33 }
  0xae   : > { %v486_v36 = vpop.f32.mrf.mxu0 }
  0xaf   : > { %v487_v37 = vadd.f32 %v2499_v34, %v486_v36  ;;  %v554_v38 = vpop.f32.mrf.mxu1 }
  0xb0   : > { %v555_v39 = vadd.f32 %v2504_v35, %v554_v38 }
  0xb1   : > { %v594_v40 = vpack.c.bf16 %v487_v37, %v487_v37 }
  0xb2   : > { %v627_v41 = vpack.c.bf16 %v555_v39, %v555_v39 }
  0xb3   : > { %611 = vst.msk [vmem:[#allocation2] sm:$0xf] %vm610_vm2, %v594_v40 }
  0xb4   : > { %643 = vst.msk [vmem:[#allocation3] sm:$0xf] %vm610_vm2, %v627_v41  ;;  %v506_v42 = vpop.f32.mrf.mxu2 }
  0xb5   : > { %v507_v43 = vadd.f32 %v2499_v34, %v506_v42  ;;  %v574_v44 = vpop.f32.mrf.mxu3 }
  0xb6   : > { %v575_v45 = vadd.f32 %v2504_v35, %v574_v44  ;;  %v488_v46 = vpop.f32.mrf.mxu0 }
  0xb7   : > { %v602_v47 = vpack.c.bf16 %v507_v43, %v507_v43  ;;  %v489_v48 = vadd.f32 %v2499_v34, %v488_v46  ;;  %v556_v49 = vpop.f32.mrf.mxu1 }
  0xb8   : > { %v635_v50 = vpack.c.bf16 %v575_v45, %v575_v45  ;;  %v557_v51 = vadd.f32 %v2504_v35, %v556_v49 }
  0xb9   : > { %619 = vst.msk [vmem:[#allocation2 + $0x20] sm:$0xf] %vm610_vm2, %v602_v47  ;;  %v595_v52 = vpack.c.bf16 %v489_v48, %v489_v48 }
  0xba   : > { %651 = vst.msk [vmem:[#allocation3 + $0x20] sm:$0xf] %vm610_vm2, %v635_v50  ;;  %v628_v53 = vpack.c.bf16 %v557_v51, %v557_v51 }
  0xbb   : > { %612 = vst.msk [vmem:[#allocation2 + $0x4] sm:$0xf] %vm610_vm2, %v595_v52 }
  0xbc   : > { %644 = vst.msk [vmem:[#allocation3 + $0x4] sm:$0xf] %vm610_vm2, %v628_v53  ;;  %v508_v54 = vpop.f32.mrf.mxu2 }
  0xbd   : > { %v509_v55 = vadd.f32 %v2499_v34, %v508_v54  ;;  %v576_v56 = vpop.f32.mrf.mxu3 }
  0xbe   : > { %v577_v57 = vadd.f32 %v2504_v35, %v576_v56  ;;  %v491_v58 = vpop.f32.mrf.mxu0 }
  0xbf   : > { %v603_v59 = vpack.c.bf16 %v509_v55, %v509_v55  ;;  %v492_v60 = vadd.f32 %v2499_v34, %v491_v58  ;;  %v559_v61 = vpop.f32.mrf.mxu1 }
  0xc0   : > { %v636_v62 = vpack.c.bf16 %v577_v57, %v577_v57  ;;  %v560_v63 = vadd.f32 %v2504_v35, %v559_v61 }
  0xc1   : > { %620 = vst.msk [vmem:[#allocation2 + $0x24] sm:$0xf] %vm610_vm2, %v603_v59  ;;  %v596_v0 = vpack.c.bf16 %v492_v60, %v492_v60 }
  0xc2   : > { %652 = vst.msk [vmem:[#allocation3 + $0x24] sm:$0xf] %vm610_vm2, %v636_v62  ;;  %v629_v1 = vpack.c.bf16 %v560_v63, %v560_v63 }
  0xc3   : > { %613 = vst.msk [vmem:[#allocation2 + $0x8] sm:$0xf] %vm610_vm2, %v596_v0 }
  0xc4   : > { %645 = vst.msk [vmem:[#allocation3 + $0x8] sm:$0xf] %vm610_vm2, %v629_v1  ;;  %v511_v2 = vpop.f32.mrf.mxu2 }
  0xc5   : > { %v512_v3 = vadd.f32 %v2499_v34, %v511_v2  ;;  %v579_v4 = vpop.f32.mrf.mxu3 }
  0xc6   : > { %v580_v5 = vadd.f32 %v2504_v35, %v579_v4  ;;  %v493_v6 = vpop.f32.mrf.mxu0 }
  0xc7   : > { %v604_v7 = vpack.c.bf16 %v512_v3, %v512_v3  ;;  %v494_v8 = vadd.f32 %v2499_v34, %v493_v6  ;;  %v561_v9 = vpop.f32.mrf.mxu1 }
  0xc8   : > { %v637_v10 = vpack.c.bf16 %v580_v5, %v580_v5  ;;  %v562_v11 = vadd.f32 %v2504_v35, %v561_v9 }
  0xc9   : > { %621 = vst.msk [vmem:[#allocation2 + $0x28] sm:$0xf] %vm610_vm2, %v604_v7  ;;  %v597_v12 = vpack.c.bf16 %v494_v8, %v494_v8 }
  0xca   : > { %653 = vst.msk [vmem:[#allocation3 + $0x28] sm:$0xf] %vm610_vm2, %v637_v10  ;;  %v630_v13 = vpack.c.bf16 %v562_v11, %v562_v11 }
  0xcb   : > { %614 = vst.msk [vmem:[#allocation2 + $0xc] sm:$0xf] %vm610_vm2, %v597_v12 }
  0xcc   : > { %646 = vst.msk [vmem:[#allocation3 + $0xc] sm:$0xf] %vm610_vm2, %v630_v13  ;;  %v513_v14 = vpop.f32.mrf.mxu2 }
  0xcd   : > { %v514_v15 = vadd.f32 %v2499_v34, %v513_v14  ;;  %v581_v16 = vpop.f32.mrf.mxu3 }
  0xce   : > { %v582_v17 = vadd.f32 %v2504_v35, %v581_v16  ;;  %v496_v18 = vpop.f32.mrf.mxu0 }
  0xcf   : > { %v605_v19 = vpack.c.bf16 %v514_v15, %v514_v15  ;;  %v497_v20 = vadd.f32 %v2499_v34, %v496_v18  ;;  %v564_v21 = vpop.f32.mrf.mxu1 }
  0xd0   : > { %v638_v22 = vpack.c.bf16 %v582_v17, %v582_v17  ;;  %v565_v23 = vadd.f32 %v2504_v35, %v564_v21 }
  0xd1   : > { %622 = vst.msk [vmem:[#allocation2 + $0x2c] sm:$0xf] %vm610_vm2, %v605_v19  ;;  %v598_v24 = vpack.c.bf16 %v497_v20, %v497_v20 }
  0xd2   : > { %654 = vst.msk [vmem:[#allocation3 + $0x2c] sm:$0xf] %vm610_vm2, %v638_v22  ;;  %v631_v25 = vpack.c.bf16 %v565_v23, %v565_v23 }
  0xd3   : > { %615 = vst.msk [vmem:[#allocation2 + $0x10] sm:$0xf] %vm610_vm2, %v598_v24 }
  0xd4   : > { %647 = vst.msk [vmem:[#allocation3 + $0x10] sm:$0xf] %vm610_vm2, %v631_v25  ;;  %v516_v26 = vpop.f32.mrf.mxu2 }
  0xd5   : > { %v517_v27 = vadd.f32 %v2499_v34, %v516_v26  ;;  %v584_v28 = vpop.f32.mrf.mxu3 }
  0xd6   : > { %v585_v29 = vadd.f32 %v2504_v35, %v584_v28  ;;  %v498_v30 = vpop.f32.mrf.mxu0 }
  0xd7   : > { %v606_v31 = vpack.c.bf16 %v517_v27, %v517_v27  ;;  %v499_v32 = vadd.f32 %v2499_v34, %v498_v30  ;;  %v566_v33 = vpop.f32.mrf.mxu1 }
  0xd8   : > { %v639_v36 = vpack.c.bf16 %v585_v29, %v585_v29  ;;  %v567_v37 = vadd.f32 %v2504_v35, %v566_v33 }
  0xd9   : > { %623 = vst.msk [vmem:[#allocation2 + $0x30] sm:$0xf] %vm610_vm2, %v606_v31  ;;  %v599_v38 = vpack.c.bf16 %v499_v32, %v499_v32 }
  0xda   : > { %655 = vst.msk [vmem:[#allocation3 + $0x30] sm:$0xf] %vm610_vm2, %v639_v36  ;;  %v632_v39 = vpack.c.bf16 %v567_v37, %v567_v37 }
  0xdb   : > { %616 = vst.msk [vmem:[#allocation2 + $0x14] sm:$0xf] %vm610_vm2, %v599_v38 }
  0xdc   : > { %648 = vst.msk [vmem:[#allocation3 + $0x14] sm:$0xf] %vm610_vm2, %v632_v39  ;;  %v518_v40 = vpop.f32.mrf.mxu2 }
  0xdd   : > { %v519_v41 = vadd.f32 %v2499_v34, %v518_v40  ;;  %v586_v42 = vpop.f32.mrf.mxu3 }
  0xde   : > { %v587_v43 = vadd.f32 %v2504_v35, %v586_v42  ;;  %v501_v44 = vpop.f32.mrf.mxu0 }
  0xdf   : > { %v607_v45 = vpack.c.bf16 %v519_v41, %v519_v41  ;;  %v502_v46 = vadd.f32 %v2499_v34, %v501_v44  ;;  %v569_v47 = vpop.f32.mrf.mxu1 }
  0xe0   : > { %v640_v48 = vpack.c.bf16 %v587_v43, %v587_v43  ;;  %v570_v49 = vadd.f32 %v2504_v35, %v569_v47 }
  0xe1   : > { %624 = vst.msk [vmem:[#allocation2 + $0x34] sm:$0xf] %vm610_vm2, %v607_v45  ;;  %v600_v50 = vpack.c.bf16 %v502_v46, %v502_v46 }
  0xe2   : > { %656 = vst.msk [vmem:[#allocation3 + $0x34] sm:$0xf] %vm610_vm2, %v640_v48  ;;  %v633_v51 = vpack.c.bf16 %v570_v49, %v570_v49 }
  0xe3   : > { %617 = vst.msk [vmem:[#allocation2 + $0x18] sm:$0xf] %vm610_vm2, %v600_v50 }
  0xe4   : > { %649 = vst.msk [vmem:[#allocation3 + $0x18] sm:$0xf] %vm610_vm2, %v633_v51  ;;  %v521_v52 = vpop.f32.mrf.mxu2 }
  0xe5   : > { %v522_v53 = vadd.f32 %v2499_v34, %v521_v52  ;;  %v589_v54 = vpop.f32.mrf.mxu3 }
  0xe6   : > { %v590_v55 = vadd.f32 %v2504_v35, %v589_v54  ;;  %v503_v56 = vpop.f32.mrf.mxu0 }
  0xe7   : > { %v608_v57 = vpack.c.bf16 %v522_v53, %v522_v53  ;;  %v504_v58 = vadd.f32 %v2499_v34, %v503_v56  ;;  %v571_v59 = vpop.f32.mrf.mxu1 }
  0xe8   : > { %v641_v60 = vpack.c.bf16 %v590_v55, %v590_v55  ;;  %v572_v61 = vadd.f32 %v2504_v35, %v571_v59 }
  0xe9   : > { %625 = vst.msk [vmem:[#allocation2 + $0x38] sm:$0xf] %vm610_vm2, %v608_v57  ;;  %v601_v62 = vpack.c.bf16 %v504_v58, %v504_v58 }
  0xea   : > { %657 = vst.msk [vmem:[#allocation3 + $0x38] sm:$0xf] %vm610_vm2, %v641_v60  ;;  %v634_v63 = vpack.c.bf16 %v572_v61, %v572_v61 }
  0xeb   : > { %618 = vst.msk [vmem:[#allocation2 + $0x1c] sm:$0xf] %vm610_vm2, %v601_v62 }
  0xec   : > { %650 = vst.msk [vmem:[#allocation3 + $0x1c] sm:$0xf] %vm610_vm2, %v634_v63  ;;  %v523_v0 = vpop.f32.mrf.mxu2 }
  0xed   : > { %v524_v1 = vadd.f32 %v2499_v34, %v523_v0  ;;  %v591_v2 = vpop.f32.mrf.mxu3 }
  0xee   : > { %v592_v3 = vadd.f32 %v2504_v35, %v591_v2 }
  0xef   : > { %v609_v4 = vpack.c.bf16 %v524_v1, %v524_v1 }
  0xf0   : > { %v642_v5 = vpack.c.bf16 %v592_v3, %v592_v3 }
  0xf1   : > { %626 = vst.msk [vmem:[#allocation2 + $0x3c] sm:$0xf] %vm610_vm2, %v609_v4 }
  0xf2   : > { %658 = vst.msk [vmem:[#allocation3 + $0x3c] sm:$0xf] %vm610_vm2, %v642_v5 }
  0xf3 PF: > { %v2033_v6 = vld [vmem:[%s2762_s2 + $0x8] sm:$0xff]  ;;  %vm775_vm3 = vcmask 64512   ;;  %v2032_v34 = vld [vmem:[%s2762_s2] sm:$0xff]  ;;  %s2298_s24 = smov 120   ;;  %v2040_v12 = vld [vmem:[#allocation2 + $0x30] sm:$0xff]  ;;  %vm681_vm4 = vcmask 261120  }
  0xf4   : > { %691 = vmatpush.bf16.msra.mxu0 %v2033_v6  ;;  %v659_v35 = vld [vmem:[%s2448_s27] sm:$0xff]  ;;  %v2055_v10 = vld [vmem:[#allocation2 + $0x28] sm:$0xff]  ;;  %v2056_v13 = vld [vmem:[#allocation2 + $0x30] sm:$0xff]  ;;  %v798_v14 = vsel %vm775_vm3, %v2040_v12, 0  ;;  %s2299_s27 = smov 112   ;;  %s2300_s15 = smov 104  }
  0xf5   : > { %v660_v11 = vpack.c.bf16 %v659_v35, %v659_v35  ;;  %977 = vrot.lane.b32.xlu1 %v2055_v10, %s2298_s24  ;;  %v2039_v16 = vld [vmem:[#allocation2 + $0x28] sm:$0xff]  ;;  %v2072_v17 = vld [vmem:[#allocation2 + $0x30] sm:$0xff]  ;;  %v2038_v21 = vld [vmem:[#allocation2 + $0x20] sm:$0xff]  ;;  %vm888_vm6 = vcmask 60416   ;;  %s2302_s20 = smov 8   ;;  %s2303_s11 = smov 24  }
  0xf6   : > { %v795_v18 = vsel %vm775_vm3, %v2039_v16, 0  ;;  %v2088_v19 = vld [vmem:[#allocation2 + $0x30] sm:$0xff]  ;;  %v2071_v22 = vld [vmem:[#allocation2 + $0x28] sm:$0xff]  ;;  %v792_v23 = vsel %vm775_vm3, %v2038_v21, 0  ;;  %v2054_v25 = vld [vmem:[#allocation2 + $0x20] sm:$0xff]  ;;  %vm1115_vm7 = vcmask 126016  }
  0xf7   : > { %v2087_v24 = vld [vmem:[#allocation2 + $0x28] sm:$0xff]  ;;  %v2037_v26 = vld [vmem:[#allocation2 + $0x18] sm:$0xff]  ;;  %v2070_v27 = vld [vmem:[#allocation2 + $0x20] sm:$0xff]  ;;  %s2304_s28 = smov 16   ;;  %vm1339_vm8 = vcmask 191616   ;;  %vm1563_vm9 = vcmask 257216  }
  0xf8   : > { %v2057_v7 = vld [vmem:[#allocation2 + $0x38] sm:$0xff]  ;;  %692 = vmatpush.bf16.msra.mxu0 %v2032_v34  ;;  %v789_v28 = vsel %vm775_vm3, %v2037_v26, 0  ;;  %v2086_v29 = vld [vmem:[#allocation2 + $0x20] sm:$0xff]  ;;  %v2036_v30 = vld [vmem:[#allocation2 + $0x10] sm:$0xff]  ;;  %v699_v26 = vlaneseq  ;;  %s2025_s29 = sshll.u32 %s2284_s17, 1 }
  0xf9   : > { %v2041_v8 = vld [vmem:[#allocation2 + $0x38] sm:$0xff]  ;;  %981 = vrot.lane.b32.xlu0 %v2057_v7, %s2298_s24  ;;  %v786_v32 = vsel %vm775_vm3, %v2036_v30, 0  ;;  %v2035_v36 = vld [vmem:[#allocation2 + $0x8] sm:$0xff]  ;;  %v2050_v37 = vld [vmem:[#allocation2] sm:$0xff]  ;;  %s1614_s23 = sadd.s32 %s2280_s16, %s2025_s29  ;;  %s2792_s16 = sand.u32 1, %s2272_s14  }
  0xfa   : > { %v801_v9 = vsel %vm775_vm3, %v2041_v8, 0  ;;  %v2073_v15 = vld [vmem:[#allocation2 + $0x38] sm:$0xff]  ;;  %v783_v38 = vsel %vm775_vm3, %v2035_v36, 0  ;;  %v2034_v39 = vld [vmem:[#allocation2] sm:$0xff]  ;;  %v2084_v40 = vld [vmem:[#allocation2 + $0x10] sm:$0xff]  ;;  %s1604_s17 = scalar_lea.sflag [#allocation6], %s2792_s16 }
  0xfb   : > { %803 = vmatpush.bf16.xpose.msra.mxu1 %v801_v9  ;;  %1754 = vmatmul.msk.bf16.vlgmr.msra.gmra.mxu0 %vm681_vm4, %v660_v11  ;;  %v2089_v20 = vld [vmem:[#allocation2 + $0x38] sm:$0xff]  ;;  %v780_v41 = vsel %vm775_vm3, %v2034_v39, 0  ;;  %v2067_v42 = vld [vmem:[#allocation2 + $0x8] sm:$0xff]  ;;  %v2068_v43 = vld [vmem:[#allocation2 + $0x10] sm:$0xff]  ;;  %v2301_v36 = vmov -1e+30  }
  0xfc   : > { %1429 = vrot.lane.b32.xlu2 %v2089_v20, %s2300_s15  ;;  %v2069_v31 = vld [vmem:[#allocation2 + $0x18] sm:$0xff]  ;;  %v2066_v45 = vld [vmem:[#allocation2] sm:$0xff]  ;;  %v2052_v46 = vld [vmem:[#allocation2 + $0x10] sm:$0xff]  ;;  %s2222_s29 = scalar_lea.hbm %s2770_s10, 32 }
  0xfd   : > { %1205 = vrot.lane.b32.xlu1 %v2073_v15, %s2299_s27  ;;  %v2085_v33 = vld [vmem:[#allocation2 + $0x18] sm:$0xff]  ;;  %v2051_v47 = vld [vmem:[#allocation2 + $0x8] sm:$0xff]  ;;  %v2184_v48 = vld [vmem:[%s2763_s3] ss:$0 sm:$0xff] }
  0xfe   : > { %v2053_v44 = vld [vmem:[#allocation2 + $0x18] sm:$0xff]  ;;  %v2083_v63 = vld [vmem:[#allocation2 + $0x8] sm:$0xff]  ;;  %v2082_v1 = vld [vmem:[#allocation2] sm:$0xff] }
  0xff   : > { %v2047_v30 = vld [vmem:[#allocation3 + $0x28] sm:$0xff]  ;;  %v2045_v39 = vld [vmem:[#allocation3 + $0x18] sm:$0xff] }
 0x101   : > { %979 = vrot.lane.b32.xlu0 %v2056_v13, %s2298_s24 }
 0x103   : > { %804 = vmatpush.bf16.xpose.msra.mxu1 %v798_v14 }
 0x104   : > { %975 = vrot.lane.b32.xlu2 %v2054_v25, %s2298_s24  ;;  %v2049_v25 = vld [vmem:[#allocation3 + $0x38] sm:$0xff] }
 0x105   : > { %1427 = vrot.lane.b32.xlu1 %v2088_v19, %s2300_s15  ;;  %872 = vmatpush.bf16.msra.mxu2 %v2049_v25  ;;  %v2090_v25 = vld [vmem:[#allocation3] sm:$0xff] }
 0x109   : > { %1203 = vrot.lane.b32.xlu0 %v2072_v17, %s2299_s27 }
 0x10b   : > { %805 = vmatpush.bf16.xpose.msra.mxu1 %v795_v18 }
 0x10c   : > { %973 = vrot.lane.b32.xlu2 %v2053_v44, %s2298_s24  ;;  %v2044_v44 = vld [vmem:[#allocation3 + $0x10] sm:$0xff] }
 0x10d   : > { %1425 = vrot.lane.b32.xlu1 %v2087_v24, %s2300_s15 }
 0x111   : > { %1201 = vrot.lane.b32.xlu0 %v2071_v22, %s2299_s27 }
 0x113   : > { %806 = vmatpush.bf16.xpose.msra.mxu1 %v792_v23 }
 0x114   : > { %971 = vrot.lane.b32.xlu2 %v2052_v46, %s2298_s24  ;;  %v2043_v46 = vld [vmem:[#allocation3 + $0x8] sm:$0xff] }
 0x115   : > { %1423 = vrot.lane.b32.xlu1 %v2086_v29, %s2300_s15  ;;  %v700_v29 = vand.u32 127, %v699_v26 }
 0x117   : > { %vm701_vm5 = vcmp.lt.s32.totalorder %v700_v29, 8 }
 0x119   : > { %1199 = vrot.lane.b32.xlu0 %v2070_v27, %s2299_s27  ;;  %v2048_v27 = vld [vmem:[#allocation3 + $0x30] sm:$0xff] }
 0x11a   : > { %873 = vmatpush.bf16.msra.mxu2 %v2048_v27 }
 0x11b   : > { %807 = vmatpush.bf16.xpose.msra.mxu1 %v789_v28  ;;  %v2064_v28 = vld [vmem:[#allocation3 + $0x30] sm:$0xff] }
 0x11c   : > { %969 = vrot.lane.b32.xlu2 %v2051_v47, %s2298_s24 }
 0x11d   : > { %1421 = vrot.lane.b32.xlu1 %v2085_v33, %s2300_s15  ;;  %v2046_v33 = vld [vmem:[#allocation3 + $0x20] sm:$0xff] }
 0x11e   : > { %874 = vmatpush.bf16.msra.mxu2 %v2047_v30 }
 0x121   : > { %1197 = vrot.lane.b32.xlu0 %v2069_v31, %s2299_s27 }
 0x122   : > { %875 = vmatpush.bf16.msra.mxu2 %v2046_v33 }
 0x123   : > { %808 = vmatpush.bf16.xpose.msra.mxu1 %v786_v32  ;;  %v2097_v32 = vld [vmem:[#allocation3 + $0x38] sm:$0xff] }
 0x125   : > { %1195 = vrot.lane.b32.xlu1 %v2068_v43, %s2299_s27  ;;  %v2096_v43 = vld [vmem:[#allocation3 + $0x30] sm:$0xff] }
 0x126   : > { %876 = vmatpush.bf16.msra.mxu2 %v2045_v39 }
 0x129   : > { %967 = vrot.lane.b32.xlu0 %v2050_v37, %s2298_s24  ;;  %v2645_v37 = vsel %vm701_vm5, 0.0, %v2301_v36 }
 0x12a   : > { %877 = vmatpush.bf16.msra.mxu2 %v2044_v44 }
 0x12b   : > { %809 = vmatpush.bf16.xpose.msra.mxu1 %v783_v38 }
 0x12e   : > { %878 = vmatpush.bf16.msra.mxu2 %v2043_v46 }
 0x131   : > { %1419 = vrot.lane.b32.xlu0 %v2084_v40, %s2300_s15 }
 0x133   : > { %810 = vmatpush.bf16.xpose.msra.mxu1 %v780_v41 }
 0x139   : > { %1193 = vrot.lane.b32.xlu0 %v2067_v42, %s2299_s27 }
 0x141   : > { %1191 = vrot.lane.b32.xlu0 %v2066_v45, %s2299_s27 }
 0x156   : > { %v1430_v58 = vpop.permute.xlu2 %1429 }
 0x157   : > { %v1456_v60 = vsel %vm775_vm3, %v1430_v58, 0 }
 0x158   : > { %1458 = vmatpush.bf16.xpose.msrb.mxu1 %v1456_v60  ;;  %v2095_v60 = vld [vmem:[#allocation3 + $0x28] sm:$0xff] }
 0x15e   : > { %v976_v2 = vpop.permute.xlu2 %975 }
 0x15f   : > { %v999_v4 = vsel %vm775_vm3, %v976_v2, 0 }
 0x166   : > { %v974_v12 = vpop.permute.xlu2 %973 }
 0x167   : > { %v978_v53 = vpop.permute.xlu1 %977  ;;  %v996_v13 = vsel %vm775_vm3, %v974_v12, 0 }
 0x168   : > { %v1002_v0 = vsel %vm775_vm3, %v978_v53, 0 }
 0x16b   : > { %v982_v51 = vpop.permute.xlu0 %981 }
 0x16c   : > { %v1008_v52 = vsel %vm775_vm3, %v982_v51, 0  ;;  %v2042_v51 = vld [vmem:[#allocation3] sm:$0xff] }
 0x16d   : > { %1010 = vmatpush.bf16.xpose.msra.mxu3 %v1008_v52  ;;  %879 = vmatpush.bf16.msra.mxu2 %v2042_v51  ;;  %v2075_v51 = vld [vmem:[#allocation3 + $0x8] sm:$0xff] }
 0x16e   : > { %v972_v15 = vpop.permute.xlu2 %971 }
 0x16f   : > { %v2617_v62 = vpop.permute.xlu1 %1205  ;;  %v993_v16 = vsel %vm775_vm3, %v972_v15, 0 }
 0x170   : > { %v1232_v52 = vsel %vm775_vm3, %v2617_v62, 0  ;;  %v2060_v62 = vld [vmem:[#allocation3 + $0x10] sm:$0xff] }
 0x171   : > { %1234 = vmatpush.bf16.xpose.msrb.mxu2 %v1232_v52 }
 0x173   : > { %v980_v59 = vpop.permute.xlu0 %979 }
 0x174   : > { %v1005_v61 = vsel %vm775_vm3, %v980_v59, 0  ;;  %v2081_v59 = vld [vmem:[#allocation3 + $0x38] sm:$0xff] }
 0x175   : > { %1011 = vmatpush.bf16.xpose.msra.mxu3 %v1005_v61 }
 0x176   : > { %v970_v18 = vpop.permute.xlu2 %969 }
 0x177   : > { %v1428_v3 = vpop.permute.xlu1 %1427  ;;  %v990_v19 = vsel %vm775_vm3, %v970_v18, 0 }
 0x178   : > { %v694_v49 = vpop.f32.mrf.mxu0  ;;  %v1453_v5 = vsel %vm775_vm3, %v1428_v3, 0  ;;  %v2079_v3 = vld [vmem:[#allocation3 + $0x28] sm:$0xff] }
 0x179   : > { %v695_v50 = vadd.f32 %v2184_v48, %v694_v49  ;;  %1459 = vmatpush.bf16.xpose.msrb.mxu1 %v1453_v5  ;;  %v2063_v49 = vld [vmem:[#allocation3 + $0x28] sm:$0xff] }
 0x17a   : > { %v2059_v5 = vld [vmem:[#allocation3 + $0x8] sm:$0xff] }
 0x17b   : > { %v698_v54 = vpack.c.bf16 %v695_v50, %v695_v50  ;;  %v2626_v8 = vpop.permute.xlu0 %1203  ;;  %v2077_v50 = vld [vmem:[#allocation3 + $0x18] sm:$0xff] }
 0x17d   : > { %v923_v55 = vunpack.c.l.b16 %v698_v54  ;;  %1787 = vmatmul.msk.bf16.vlgmr.msra.gmra.mxu1 %vm775_vm3, %v698_v54  ;;  %1012 = vmatpush.bf16.xpose.msra.mxu3 %v1002_v0  ;;  %v2062_v54 = vld [vmem:[#allocation3 + $0x20] sm:$0xff] }
 0x17f   : > { %v924_v56 = vpack.c.b16 %v923_v55, %v923_v55  ;;  %v1426_v6 = vpop.permute.xlu1 %1425  ;;  %v1229_v55 = vsel %vm775_vm3, %v2626_v8, 0 }
 0x180   : > { %v696_v57 = vpop.f32.mrf.mxu0  ;;  %v1450_v7 = vsel %vm775_vm3, %v1426_v6, 0  ;;  %1235 = vmatpush.bf16.xpose.msrb.mxu2 %v1229_v55 }
 0x181   : > { %1149 = vrot.lane.b32.xlu0 %v924_v56, %s2299_s27  ;;  %925 = vrot.lane.b32.xlu1 %v924_v56, %s2298_s24  ;;  %v2061_v57 = vld [vmem:[#allocation3 + $0x18] sm:$0xff] }
 0x182   : > { %1460 = vmatpush.bf16.xpose.msrb.mxu1 %v1450_v7  ;;  %v2093_v7 = vld [vmem:[#allocation3 + $0x18] sm:$0xff] }
 0x183   : > { %v2629_v9 = vpop.permute.xlu0 %1201 }
 0x184   : > { %v1226_v58 = vsel %vm775_vm3, %v2629_v9, 0 }
 0x185   : > { %1013 = vmatpush.bf16.xpose.msra.mxu3 %v999_v4  ;;  %v2058_v4 = vld [vmem:[#allocation3] sm:$0xff] }
 0x187   : > { %v1424_v34 = vpop.permute.xlu1 %1423 }
 0x188   : > { %v1447_v35 = vsel %vm775_vm3, %v1424_v34, 0  ;;  %1236 = vmatpush.bf16.xpose.msrb.mxu2 %v1226_v58 }
 0x189   : > { %1417 = vrot.lane.b32.xlu1 %v2083_v63, %s2300_s15  ;;  %1083 = vrot.lane.b32.xlu0 %v2064_v28, %s2298_s24  ;;  %v2080_v63 = vld [vmem:[#allocation3 + $0x30] sm:$0xff] }
 0x18a   : > { %1461 = vmatpush.bf16.xpose.msrb.mxu1 %v1447_v35  ;;  %v2078_v35 = vld [vmem:[#allocation3 + $0x20] sm:$0xff] }
 0x18b   : > { %v2633_v14 = vpop.permute.xlu0 %1199 }
 0x18c   : > { %v1223_v61 = vsel %vm775_vm3, %v2633_v14, 0 }
 0x18d   : > { %1014 = vmatpush.bf16.xpose.msra.mxu3 %v996_v13 }
 0x18f   : > { %v1422_v10 = vpop.permute.xlu1 %1421 }
 0x190   : > { %v1444_v11 = vsel %vm775_vm3, %v1422_v10, 0  ;;  %1237 = vmatpush.bf16.xpose.msrb.mxu2 %v1223_v61  ;;  %v2092_v10 = vld [vmem:[#allocation3 + $0x10] sm:$0xff] }
 0x191   : > { %1415 = vrot.lane.b32.xlu1 %v2082_v1, %s2300_s15  ;;  %1533 = vrot.lane.b32.xlu0 %v2097_v32, %s2300_s15  ;;  %v2094_v1 = vld [vmem:[#allocation3 + $0x20] sm:$0xff] }
 0x192   : > { %1462 = vmatpush.bf16.xpose.msrb.mxu1 %v1444_v11 }
 0x193   : > { %v2636_v17 = vpop.permute.xlu0 %1197 }
 0x194   : > { %v1220_v0 = vsel %vm775_vm3, %v2636_v17, 0 }
 0x195   : > { %1015 = vmatpush.bf16.xpose.msra.mxu3 %v993_v16 }
 0x197   : > { %v2641_v24 = vpop.permute.xlu1 %1195 }
 0x198   : > { %1238 = vmatpush.bf16.xpose.msrb.mxu2 %v1220_v0  ;;  %v1217_v2 = vsel %vm775_vm3, %v2641_v24, 0 }
 0x199   : > { %1373 = vrot.lane.b32.xlu1 %v924_v56, %s2300_s15  ;;  %1531 = vrot.lane.b32.xlu0 %v2096_v43, %s2300_s15  ;;  %v2065_v56 = vld [vmem:[#allocation3 + $0x38] sm:$0xff] }
 0x19b   : > { %v968_v20 = vpop.permute.xlu0 %967 }
 0x19c   : > { %v987_v21 = vsel %vm775_vm3, %v968_v20, 0 }
 0x19d   : > { %1016 = vmatpush.bf16.xpose.msra.mxu3 %v990_v19 }
 0x1a0   : > { %1239 = vmatpush.bf16.xpose.msrb.mxu2 %v1217_v2 }
 0x1a1   : > { %1081 = vrot.lane.b32.xlu1 %v2063_v49, %s2298_s24  ;;  %1301 = vrot.lane.b32.xlu0 %v2077_v50, %s2299_s27 }
 0x1a3   : > { %v1420_v22 = vpop.permute.xlu0 %1419 }
 0x1a4   : > { %v1441_v23 = vsel %vm775_vm3, %v1420_v22, 0 }
 0x1a5   : > { %1017 = vmatpush.bf16.xpose.msra.mxu3 %v987_v21  ;;  %1463 = vmatpush.bf16.xpose.msrb.mxu1 %v1441_v23  ;;  %v2091_v21 = vld [vmem:[#allocation3 + $0x8] sm:$0xff] }
 0x1a9   : > { %1079 = vrot.lane.b32.xlu1 %v2062_v54, %s2298_s24  ;;  %v2074_v54 = vld [vmem:[#allocation3] sm:$0xff] }
 0x1ab   : > { %v1194_v6 = vpop.permute.xlu0 %1193 }
 0x1ac   : > { %v1214_v8 = vsel %vm775_vm3, %v1194_v6, 0 }
 0x1ad   : > { %1240 = vmatpush.bf16.xpose.msrb.mxu2 %v1214_v8 }
 0x1b1   : > { %1077 = vrot.lane.b32.xlu1 %v2061_v57, %s2298_s24 }
 0x1b3   : > { %v1192_v34 = vpop.permute.xlu0 %1191 }
 0x1b4   : > { %v1211_v9 = vsel %vm775_vm3, %v1192_v34, 0 }
 0x1b5   : > { %1241 = vmatpush.bf16.xpose.msrb.mxu2 %v1211_v9 }
 0x1b9   : > { %1529 = vrot.lane.b32.xlu1 %v2095_v60, %s2300_s15 }
 0x1c1   : > { %1307 = vrot.lane.b32.xlu1 %v2080_v63, %s2299_s27 }
 0x1c9   : > { %1073 = vrot.lane.b32.xlu1 %v2059_v5, %s2298_s24 }
 0x1d1   : > { %1525 = vrot.lane.b32.xlu1 %v2093_v7, %s2300_s15 }
 0x1d9   : > { %1303 = vrot.lane.b32.xlu1 %v2078_v35, %s2299_s27 }
 0x1e1   : > { %1523 = vrot.lane.b32.xlu1 %v2092_v10, %s2300_s15 }
 0x1f3   : > { %v926_v31 = vpop.permute.xlu1 %925  ;;  %v1150_v22 = vpop.permute.xlu0 %1149 }
 0x1f4   : > { %1852 = vmatmul.msk.bf16.vlgmr.msra.gmra.mxu3 %vm775_vm3, %v926_v31 }
 0x1fa   : > { %v812_v38 = vpop.f32.mrf.mxu1 }
 0x1fb   : > { %v2649_v40 = vadd.f32 %v812_v38, %v2645_v37  ;;  %v1418_v41 = vpop.permute.xlu1 %1417  ;;  %v1084_v27 = vpop.permute.xlu0 %1083 }
 0x1fc   : > { %v1438_v42 = vsel %vm775_vm3, %v1418_v41, 0 }
 0x1fd   : > { %1464 = vmatpush.bf16.xpose.msrb.mxu1 %v1438_v42  ;;  %816 = vmax.xlane.f32.xlu2 %v2649_v40 }
 0x202   : > { %v814_v45 = vpop.f32.mrf.mxu1 }
 0x203   : > { %v1416_v47 = vpop.permute.xlu1 %1415  ;;  %v1534_v30 = vpop.permute.xlu0 %1533 }
 0x204   : > { %v1435_v48 = vsel %vm775_vm3, %v1416_v47, 0  ;;  %1543 = vmatpush.bf16.msrb.mxu3 %v1534_v30 }
 0x205   : > { %1465 = vmatpush.bf16.xpose.msrb.mxu1 %v1435_v48  ;;  %v2076_v48 = vld [vmem:[#allocation3 + $0x10] sm:$0xff] }
 0x20b   : > { %v1374_v53 = vpop.permute.xlu1 %1373  ;;  %v1532_v33 = vpop.permute.xlu0 %1531 }
 0x20c   : > { %1982 = vmatmul.msk.bf16.vlgmr.msrb.gmra.mxu1 %vm775_vm3, %v1374_v53  ;;  %1544 = vmatpush.bf16.msrb.mxu3 %v1532_v33 }
 0x213   : > { %v1082_v24 = vpop.permute.xlu1 %1081  ;;  %v1302_v46 = vpop.permute.xlu0 %1301 }
 0x215   : > { %1085 = vrot.lane.b32.xlu2 %v2065_v56, %s2298_s24 }
 0x21b   : > { %v1080_v26 = vpop.permute.xlu1 %1079 }
 0x21d   : > { %1309 = vrot.lane.b32.xlu2 %v2081_v59, %s2299_s27 }
 0x223   : > { %v1078_v29 = vpop.permute.xlu1 %1077 }
 0x225   : > { %1075 = vrot.lane.b32.xlu2 %v2060_v62, %s2298_s24 }
 0x22b   : > { %v1530_v32 = vpop.permute.xlu1 %1529 }
 0x22c   : > { %1545 = vmatpush.bf16.msrb.mxu3 %v1530_v32  ;;  %v2098_v32 = vld [vmem:[%s2768_s8] sm:$0xff] }
 0x22d   : > { %1527 = vrot.lane.b32.xlu2 %v2094_v1, %s2300_s15 }
 0x233   : > { %v1308_v38 = vpop.permute.xlu1 %1307 }
 0x235   : > { %1305 = vrot.lane.b32.xlu2 %v2079_v3, %s2299_s27 }
 0x23d   : > { %1071 = vrot.lane.b32.xlu2 %v2058_v4, %s2298_s24  ;;  %s2026_s24 = sshll.u32 %s1614_s23, 3 }
 0x23e   : > { %s1616_s18 = scalar_lea.hbm %s2770_s10, %s2026_s24 }
 0x23f   : > { %s1620_s22 = sshll.u32 %s1616_s18, 4  ;;  %s1621_s22 = int_to_ptr.hbm [resolvable:$true] %s1620_s22 }
 0x240   : > { %s2216_s25 = sshra.s32 %s1621_s22, 4  ;;  %s2217_s25 = int_to_ptr.hbm [resolvable:$true] %s2216_s25 }
 0x241   : > { %p2223_p5 = scmp.lt.s32.totalorder %s2217_s25, %s2770_s10 }
 0x270   : > { %v817_v11 = vpop.xlane.xlu2 %816 }
 0x271   : > { %v818_v12 = vsub.f32 %v2649_v40, %v817_v11  ;;  %v1074_v40 = vpop.permute.xlu1 %1073 }
 0x273   : > { %v819_v13 = vmul.f32 1.442695, %v818_v12 }
 0x275   : > { %2186 = vpow2.f32 %v819_v13 }
 0x277   : > { %v1019_v14 = vpop.f32.mrf.mxu3 }
 0x278   : > { %v1020_v15 = vadd.f32 %v1019_v14, %v2645_v37  ;;  %v1086_v28 = vpop.permute.xlu2 %1085 }
 0x279   : > { %1095 = vmatpush.bf16.msrb.mxu0 %v1086_v28  ;;  %v1526_v42 = vpop.permute.xlu1 %1525 }
 0x27a   : > { %1023 = vmax.xlane.f32.xlu0 %v1020_v15 }
 0x27b   : > { %v2187_v16 = vpop.eup %2186 }
 0x27c   : > { %v823_v17 = vpack.c.bf16 %v2187_v16, %v2187_v16 }
 0x27d   : > { %1096 = vmatpush.bf16.msrb.mxu0 %v1084_v27 }
 0x27e   : > { %880 = vmatmul.bf16.vlgmr.msra.gmra.mxu2 %v823_v17 }
 0x27f   : > { %v1021_v18 = vpop.f32.mrf.mxu3 }
 0x280   : > { %v1310_v31 = vpop.permute.xlu2 %1309 }
 0x281   : > { %1097 = vmatpush.bf16.msrb.mxu0 %v1082_v24  ;;  %v1304_v44 = vpop.permute.xlu1 %1303  ;;  %v2099_v24 = vld [vmem:[%s2768_s8 + $0x8] sm:$0xff] }
 0x285   : > { %1098 = vmatpush.bf16.msrb.mxu0 %v1080_v26 }
 0x288   : > { %v1076_v36 = vpop.permute.xlu2 %1075 }
 0x289   : > { %v1467_v19 = vpop.f32.mrf.mxu1  ;;  %1099 = vmatpush.bf16.msrb.mxu0 %v1078_v29  ;;  %v1524_v45 = vpop.permute.xlu1 %1523 }
 0x28a   : > { %v2689_v20 = vadd.f32 %v1467_v19, %v2645_v37 }
 0x28c   : > { %1471 = vmax.xlane.f32.xlu2 %v2689_v20 }
 0x28d   : > { %1100 = vmatpush.bf16.msrb.mxu0 %v1076_v36 }
 0x28e   : > { %1917 = vmatmul.msk.bf16.vlgmr.msrb.gmra.mxu2 %vm775_vm3, %v1150_v22  ;;  %1521 = vrot.lane.b32.xlu0 %v2091_v21, %s2300_s15 }
 0x290   : > { %v1528_v39 = vpop.permute.xlu2 %1527 }
 0x291   : > { %v1469_v23 = vpop.f32.mrf.mxu1  ;;  %1546 = vmatpush.bf16.msrb.mxu3 %v1528_v39  ;;  %1101 = vmatpush.bf16.msrb.mxu0 %v1074_v40  ;;  %v2185_v39 = vld [vmem:[%s2769_s9] ss:$0 sm:$0xff] }
 0x295   : > { %1547 = vmatpush.bf16.msrb.mxu3 %v1526_v42 }
 0x296   : > { %1299 = vrot.lane.b32.xlu0 %v2076_v48, %s2299_s27 }
 0x298   : > { %v1306_v41 = vpop.permute.xlu2 %1305 }
 0x299   : > { %1548 = vmatpush.bf16.msrb.mxu3 %v1524_v45 }
 0x29e   : > { %1297 = vrot.lane.b32.xlu0 %v2075_v51, %s2299_s27 }
 0x2a0   : > { %v1072_v43 = vpop.permute.xlu2 %1071 }
 0x2a1   : > { %1102 = vmatpush.bf16.msrb.mxu0 %v1072_v43 }
 0x2a4   : > { %1519 = vrot.lane.b32.xlu2 %v2090_v25, %s2300_s15 }
 0x2a5   : > { %1319 = vmatpush.bf16.msra.mxu0 %v1310_v31 }
 0x2a6   : > { %1295 = vrot.lane.b32.xlu0 %v2074_v54, %s2299_s27 }
 0x2a9   : > { %1320 = vmatpush.bf16.msra.mxu0 %v1308_v38 }
 0x2ad   : > { %1321 = vmatpush.bf16.msra.mxu0 %v1306_v41 }
 0x2b1   : > { %1322 = vmatpush.bf16.msra.mxu0 %v1304_v44 }
 0x2b5   : > { %1323 = vmatpush.bf16.msra.mxu0 %v1302_v46 }
 0x2cd   : > { %821 = vadd.xlane.f32.xlu2 %v2187_v16 }
 0x2ed   : > { %v1024_v47 = vpop.xlane.xlu0 %1023 }
 0x2ee   : > { %v1025_v49 = vsub.f32 %v1020_v15, %v1024_v47 }
 0x2f0   : > { %v1026_v50 = vmul.f32 1.442695, %v1025_v49 }
 0x2f2   : > { %2188 = vpow2.f32 %v1026_v50 }
 0x2f8   : > { %v2189_v52 = vpop.eup %2188 }
 0x2f9   : > { %v1030_v53 = vpack.c.bf16 %v2189_v52, %v2189_v52 }
 0x2fb   : > { %1103 = vmatmul.bf16.vlgmr.msrb.gmra.mxu0 %v1030_v53 }
 0x2ff   : > { %v1472_v55 = vpop.xlane.xlu2 %1471 }
 0x300   : > { %v1473_v56 = vsub.f32 %v2689_v20, %v1472_v55  ;;  %v1522_v57 = vpop.permute.xlu0 %1521 }
 0x301   : > { %v881_v58 = vpop.f32.mrf.mxu2  ;;  %1549 = vmatpush.bf16.msrb.mxu3 %v1522_v57 }
 0x302   : > { %v1474_v59 = vmul.f32 1.442695, %v1473_v56 }
 0x304   : > { %2190 = vpow2.f32 %v1474_v59 }
 0x307   : > { %v1520_v60 = vpop.permute.xlu2 %1519 }
 0x308   : > { %1550 = vmatpush.bf16.msrb.mxu3 %v1520_v60  ;;  %v1300_v7 = vpop.permute.xlu0 %1299 }
 0x309   : > { %v883_v61 = vpop.f32.mrf.mxu2  ;;  %1324 = vmatpush.bf16.msra.mxu0 %v1300_v7 }
 0x30a   : > { %v2191_v62 = vpop.eup %2190 }
 0x30b   : > { %v1478_v63 = vpack.c.bf16 %v2191_v62, %v2191_v62 }
 0x30d   : > { %1551 = vmatmul.bf16.vlgmr.msrb.gmra.mxu3 %v1478_v63 }
 0x310   : > { %v1298_v8 = vpop.permute.xlu0 %1297 }
 0x311   : > { %v1243_v0 = vpop.f32.mrf.mxu2  ;;  %1325 = vmatpush.bf16.msra.mxu0 %v1298_v8 }
 0x312   : > { %v1244_v1 = vadd.f32 %v1243_v0, %v2645_v37 }
 0x314   : > { %1247 = vmax.xlane.f32.xlu1 %v1244_v1 }
 0x318   : > { %v1296_v34 = vpop.permute.xlu0 %1295 }
 0x319   : > { %v1245_v2 = vpop.f32.mrf.mxu2  ;;  %1326 = vmatpush.bf16.msra.mxu0 %v1296_v34 }
 0x31c   : > { %1028 = vadd.xlane.f32.xlu1 %v2189_v52 }
 0x31d   : > { %1595 = vmatpush.bf16.msrb.mxu0 %v2099_v24 }
 0x321   : > { %1596 = vmatpush.bf16.msrb.mxu0 %v2098_v32 }
 0x324   : > { %1476 = vadd.xlane.f32.xlu1 %v2191_v62 }
 0x340   : > { %v822_v3 = vpop.xlane.xlu2 %821 }
 0x341   : > { %2192 = vrcp.f32 %v822_v3 }
 0x347   : > { %v2193_v4 = vpop.eup %2192 }
 0x348   : > { %v886_v5 = vmul.f32 %v2193_v4, %v881_v58 }
 0x34a   : > { %v887_v6 = vpack.c.bf16 %v886_v5, %v886_v5 }
 0x34c   : > { %889 = vst.msk [vmem:[#allocation4] sm:$0xf] %vm888_vm6, %v887_v6 }
 0x378   : > { %v1104_v35 = vpop.f32.mrf.mxu0 }
 0x380   : > { %v1106_v9 = vpop.f32.mrf.mxu0 }
 0x387   : > { %v1248_v37 = vpop.xlane.xlu1 %1247 }
 0x388   : > { %v1249_v10 = vsub.f32 %v1244_v1, %v1248_v37 }
 0x38a   : > { %v1250_v11 = vmul.f32 1.442695, %v1249_v10 }
 0x38c   : > { %2194 = vpow2.f32 %v1250_v11 }
 0x38f   : > { %v1029_v12 = vpop.xlane.xlu1 %1028 }
 0x390   : > { %2196 = vrcp.f32 %v1029_v12  ;;  %v1552_v13 = vpop.f32.mrf.mxu3 }
 0x392   : > { %v2195_v14 = vpop.eup %2194 }
 0x393   : > { %1252 = vadd.xlane.f32.xlu0 %v2195_v14  ;;  %v1254_v15 = vpack.c.bf16 %v2195_v14, %v2195_v14 }
 0x395   : > { %1327 = vmatmul.bf16.vlgmr.msra.gmra.mxu0 %v1254_v15 }
 0x396   : > { %v2197_v16 = vpop.eup %2196 }
 0x397   : > { %v1477_v17 = vpop.xlane.xlu1 %1476  ;;  %v1109_v18 = vmul.f32 %v2197_v16, %v1104_v35 }
 0x398   : > { %2198 = vrcp.f32 %v1477_v17  ;;  %v1554_v19 = vpop.f32.mrf.mxu3 }
 0x399   : > { %v1110_v20 = vpack.c.bf16 %v1109_v18, %v1109_v18 }
 0x39b   : > { %1112 = vrot.lane.b32.xlu1 %v1110_v20, %s2302_s20 }
 0x39e   : > { %v2199_v21 = vpop.eup %2198 }
 0x39f   : > { %v1557_v22 = vmul.f32 %v2199_v21, %v1552_v13 }
 0x3a1   : > { %v1558_v23 = vpack.c.bf16 %v1557_v22, %v1557_v22 }
 0x3a7   : > { %1560 = vrot.lane.b32.xlu0 %v1558_v23, %s2303_s11  ;;  %s1618_s11 = sshll.u32 %s389_s12, 4  ;;  %s1619_s11 = int_to_ptr.vmem [resolvable:$true] %s1618_s11 }
 0x406   : > { %v1253_v25 = vpop.xlane.xlu0 %1252 }
 0x407   : > { %2200 = vrcp.f32 %v1253_v25 }
 0x40d   : > { %v1113_v26 = vpop.permute.xlu1 %1112  ;;  %v2201_v27 = vpop.eup %2200 }
 0x40e   : > { %1116 = vst.msk [vmem:[#allocation4] sm:$0xf] %vm1115_vm7, %v1113_v26 }
 0x412   : > { %v1328_v28 = vpop.f32.mrf.mxu0 }
 0x413   : > { %v1333_v29 = vmul.f32 %v2201_v27, %v1328_v28 }
 0x415   : > { %v1334_v30 = vpack.c.bf16 %v1333_v29, %v1333_v29 }
 0x417   : > { %1336 = vrot.lane.b32.xlu1 %v1334_v30, %s2304_s28  ;;  %s2218_s28 = scalar_lea.hbm %s2217_s25, 8 }
 0x418   : > { %p2219_p1 = scmp.ne.s32.totalorder %s2217_s25, %s2218_s28  ;;  %p2224_p6 = scmp.lt.s32.totalorder %s2222_s29, %s2218_s28 }
 0x419   : > { %v1561_v36 = vpop.permute.xlu0 %1560 }
 0x41a   : > { %v1330_v31 = vpop.f32.mrf.mxu0  ;;  %p2220_p2 = pnand %p2219_p1, %p2411_p3  ;;  %p2225_p7 = por %p2224_p6, %p2223_p5 }
 0x41c   : > { %p2221_p4 = pneg %p2220_p2 }
 0x41e   : > { %p2226_p9 = pnand %p2225_p7, %p2221_p4 }
 0x489   : > { %v1337_v33 = vpop.permute.xlu1 %1336 }
 0x48a   : > { %1340 = vst.msk [vmem:[#allocation4] sm:$0xf] %vm1339_vm8, %v1337_v33 }
 0x48b   : > { %1564 = vst.msk [vmem:[#allocation4] sm:$0xf] %vm1563_vm9, %v1561_v36 }
 0x492   : > { %v1565_v38 = vld [vmem:[#allocation4] sm:$0xf] }
 0x493   : > { %2023 = vmatmul.msk.bf16.vlgmr.msrb.gmra.mxu0 %vm681_vm4, %v1565_v38 }
 0x510   : > { %v1598_v40 = vpop.f32.mrf.mxu0 }
 0x511   : > { %v1599_v41 = vadd.f32 %v2185_v39, %v1598_v40 }
 0x513   : > { %1602 = vst.msk [vmem:[%s389_s12] sm:$0xff] %vm681_vm4, %v1599_v41 }
 0x514   : > { %2229 = shalt.err (!%p2226_p9)
}
 0x515   : > { %2104 = dma.vmem_to_hbm [thread:$0]  (%p2411_p3), %s1619_s11, 128, %s1621_s22, %s1604_s17  }
 0x518   : > { %v1600_v42 = vpop.f32.mrf.mxu0 }
 0x519 PF: > { %s2793_s12 = sld [smem:[#allocation12_spill]] }
 0x51a   : > { %s2794_s21 = sld [smem:[#allocation8_spill]] }
 0x51f   : > { %p2110_p10 = scmp.ge.s32.totalorder %s2793_s12, 2 }
 0x520   : > { %s1632_s15 = sand.u32 1, %s2794_s21  }
 0x521   : > { %p2107_p11 = pnand %p2110_p10, %p2420_p8  ;;  %s1633_s18 = scalar_lea.sflag [#allocation6], %s1632_s15 }
 0x523   : > { %p2108_p12 = pneg %p2107_p11 }
 0x525   : > { %2263 = dma.done.wait (%p2108_p12), %s1633_s18, 128  }
 0x526   : > { %2265 = vsyncadd (%p2108_p12), %s1633_s18, 4294967168  ;;  %s23_s20 = sadd.s32 1, %s2793_s12   ;;  %s2796_s16 = sld [smem:[#allocation9_spill]] }
 0x527   : > { %p20_p13 = scmp.ge.s32.totalorder %s23_s20, 6   ;;  %s2797_s15 = sld [smem:[#allocation16_spill]] }
 0x528   : > { %s2798_s26 = sld [smem:[#allocation10_spill]]  ;;  %s2802_s13 = smov %s2272_s14 }
 0x529   : > { %s2799_s17 = sld [smem:[#allocation11_spill]] }
 0x52a   : > { %s2800_s18 = sld [smem:[#allocation13_spill]]  ;;  %22 = sbr.rel (!%p20_p13) target bundleno = 5 (0x5), region = 102 }
 0x52b   : > { %s2801_s19 = sld [smem:[#allocation14_spill]] }
 0x52c   : > { %s2803_s14 = smov %s2796_s16 }
 0x52e   : > { %s2804_s16 = smov %s2798_s26 }
 0x52f   :  { %1639 = vsyncpa [#allocation6], 1 }
 0x530   :  { %1641 = vsyncpa [#allocation6 + $0x1], 1 }

</bundles_post_ra>
